<compile_context>
chip_gen: v7x
topology: tpu7x:2x2x1
jax: 0.10.0
libtpu: 0.0.40
codegen_flags: <defaults>
</compile_context>

<pallas_src>
import functools

import jax
import jax.numpy as jnp
import numpy as np
from jax import lax
from jax.experimental import pallas as pl
from jax.experimental.pallas import tpu as pltpu


def _centerdet_kernel(H, W, Kc, Nb, heads_p,
                      x_ref, pos_ref, wconv_ref, bconv_ref, whead_ref,
                      bhead_ref, out_ref):
    HW = H * W
    L = Nb * HW
    cin_p = x_ref.shape[1]

    # ---- lane-concatenate the Nb images of this grid step: (cin_p, Nb*HW).
    # HW is a multiple of 128, so the concat is lane-aligned (cheap).
    xs = [x_ref[i] for i in range(Nb)]
    x = xs[0] if Nb == 1 else jnp.concatenate(xs, axis=1)

    # ---- border masks, hoisted: 4 vector compares total per grid step,
    # pre-broadcast once per consumer shape (JAX does not CSE broadcasts).
    h_pos = pos_ref[0:1, :]                      # (1, L) row index per column
    w_pos = pos_ref[1:2, :]                      # (1, L) col index per column
    up, down = h_pos >= 1, h_pos <= H - 2
    left, right = w_pos >= 1, w_pos <= W - 2

    def combine(dy, dx):
        m = None
        for c in ((up if dy == -1 else down if dy == 1 else None),
                  (left if dx == -1 else right if dx == 1 else None)):
            if c is not None:
                m = c if m is None else (m & c)
        return m

    conv_masks = {(dy, dx): (None if (dy, dx) == (0, 0)
                             else jnp.broadcast_to(combine(dy, dx), (cin_p, L)))
                  for dy in (-1, 0, 1) for dx in (-1, 0, 1)}
    pool_masks = {d: jnp.broadcast_to(combine(*d), (heads_p, L))
                  for d in ((0, -1), (0, 1), (-1, 0), (1, 0))}

    def shift(v, dy, dx, mask, fill):
        # out[c, n*HW + h*W + w] = v[c, n*HW + (h+dy)*W + (w+dx)] if in-bounds
        # else `fill`.  A (dy, dx) spatial shift is a pure XLU roll of the
        # flattened lane axis plus a hoisted border mask; roll wraparound
        # (including across image boundaries) is fully covered by the mask.
        s = dy * W + dx
        r = pltpu.roll(v, (-s) % L, axis=1) if s != 0 else v
        return r if mask is None else jnp.where(mask, r, fill)

    # ---- backbone: 3x3 conv (stride 1, zero pad 1) as 3 row-group im2col
    # matmuls accumulated in f32 (smaller VMEM/vreg peak than one 9-tap concat).
    acc = None
    for g, dy in enumerate((-1, 0, 1)):
        grp = jnp.concatenate(
            [shift(x, dy, dx, conv_masks[(dy, dx)], 0.0) for dx in (-1, 0, 1)],
            axis=0).astype(jnp.bfloat16)                         # (3*cin_p, L)
        d = jnp.dot(wconv_ref[g], grp, preferred_element_type=jnp.float32)
        acc = d if acc is None else acc + d                      # (hidden, L)
    feat = jnp.maximum(acc + bconv_ref[...], 0.0)                # ReLU, f32

    # ---- fused 1x1 heads: [heatmap ; regression ; pad] in a single matmul ----
    head = jnp.dot(whead_ref[...], feat.astype(jnp.bfloat16),
                   preferred_element_type=jnp.float32) + bhead_ref[...]

    # ---- CenterDet post-process: sigmoid + separable 3x3 max-pool (stride 1,
    # -inf pad) on the full 8-sublane block; regression rows are re-selected
    # from the raw head output afterwards (no mid-tile slicing).
    sig = jax.nn.sigmoid(head)
    row_max = jnp.maximum(
        jnp.maximum(sig, shift(sig, 0, -1, pool_masks[(0, -1)], -jnp.inf)),
        shift(sig, 0, 1, pool_masks[(0, 1)], -jnp.inf))
    pooled = jnp.maximum(
        jnp.maximum(row_max, shift(row_max, -1, 0, pool_masks[(-1, 0)], -jnp.inf)),
        shift(row_max, 1, 0, pool_masks[(1, 0)], -jnp.inf))

    is_hm = lax.broadcasted_iota(jnp.int32, (heads_p, L), 0) < Kc
    sel = jnp.where(is_hm, pooled, head).astype(out_ref.dtype)

    # One full (8,128)-aligned tile store per image (lane slices at multiples
    # of HW, which is a multiple of 128 -> unmasked vst).
    for i in range(Nb):
        out_ref[i] = sel[:, i * HW:(i + 1) * HW]


def centerdet_forward(x_nchw, params, block_n=None):
    """x_nchw: (N, Cin, H, W) float32 -> (heatmap NCHW, reg_box NCHW)."""
    wc, bc = params["wc"], params["bc"]
    whm, bhm = params["whm"], params["bhm"]
    wrg, brg = params["wrg"], params["brg"]
    N, Cin, H, W = x_nchw.shape
    hidden = wc.shape[3]
    Kc = whm.shape[1]
    R = wrg.shape[1]
    HW = H * W

    # Images per grid step: amortize per-step pipeline overhead, but keep >=2
    # grid steps so v7x's 2 TensorCores both get work on the "parallel" axis.
    if block_n is None:
        block_n = 1
        for nb in (8, 4, 2):
            if N % nb == 0 and N // nb >= 2:
                block_n = nb
                break
    Nb = block_n
    assert N % Nb == 0
    L = Nb * HW

    cin_p = -(-Cin // 8) * 8              # pad channels to whole sublane tiles
    heads_p = -(-(Kc + R) // 8) * 8       # fused output rows, padded to 8

    # Lane-dense (N, Cin, H*W) input: free row-major reshape from NCHW.
    x = x_nchw.reshape(N, Cin, HW).astype(jnp.float32)
    if cin_p != Cin:
        x = jnp.pad(x, ((0, 0), (0, cin_p - Cin), (0, 0)))

    # Weight prep (tiny, constant-folds under jit):
    #   wc (3,3,Cin,hidden) -> 3 row-group im2col weights (3, hidden, 3*Cin_pad)
    #   [whm | wrg]         -> fused head weight (heads_p, hidden)
    wc_p = jnp.pad(wc, ((0, 0), (0, 0), (0, cin_p - Cin), (0, 0)))
    w_conv = jnp.transpose(wc_p.reshape(3, 3 * cin_p, hidden),
                           (0, 2, 1)).astype(jnp.bfloat16)
    b_conv = jnp.transpose(bc).astype(jnp.float32)                # (hidden, 1)
    w_head = jnp.transpose(jnp.concatenate([whm, wrg], 1)).astype(jnp.bfloat16)
    b_head = jnp.transpose(jnp.concatenate([bhm, brg], 1)).astype(jnp.float32)
    if heads_p != Kc + R:
        w_head = jnp.pad(w_head, ((0, heads_p - (Kc + R)), (0, 0)))
        b_head = jnp.pad(b_head, ((0, heads_p - (Kc + R)), (0, 0)))

    # (h, w) index rows for the hoisted border masks, tiled Nb times to match
    # the in-kernel per-image lane concatenation (avoids vector div/mod).
    h_row = jnp.tile(jnp.repeat(jnp.arange(H, dtype=jnp.int32), W), Nb)
    w_row = jnp.tile(jnp.arange(W, dtype=jnp.int32), H * Nb)
    pos = jnp.stack([h_row, w_row], axis=0)                        # (2, Nb*HW)

    kernel = functools.partial(_centerdet_kernel, H, W, Kc, Nb, heads_p)

    grid_spec = pltpu.PrefetchScalarGridSpec(
        num_scalar_prefetch=0,
        grid=(N // Nb,),
        in_specs=[
            pl.BlockSpec((Nb, cin_p, HW), lambda n: (n, 0, 0)),
            pl.BlockSpec((2, L), lambda n: (0, 0)),
            pl.BlockSpec((3, hidden, 3 * cin_p), lambda n: (0, 0, 0)),
            pl.BlockSpec((hidden, 1), lambda n: (0, 0)),
            pl.BlockSpec((heads_p, hidden), lambda n: (0, 0)),
            pl.BlockSpec((heads_p, 1), lambda n: (0, 0)),
        ],
        out_specs=pl.BlockSpec((Nb, heads_p, HW), lambda n: (n, 0, 0)),
    )

    # TODO(synk): for production sizes (H*W >> VMEM) add a row-strip grid axis
    # with a 1-row halo in the input index_map; size the strip and
    # vmem_limit_bytes against v7x's 64 MiB (roughly half the v6e/v5e strip).
    out = pl.pallas_call(
        kernel,
        out_shape=jax.ShapeDtypeStruct((N, heads_p, HW), jnp.float32),
        grid_spec=grid_spec,
        compiler_params=pltpu.CompilerParams(
            dimension_semantics=("parallel",)),
    )(x, pos, w_conv, b_conv, w_head, b_head)

    # Lane-dense kernel output (N, heads_p, H*W): split heads, free reshapes.
    hm = out[:, :Kc, :].reshape(N, Kc, H, W)
    rg = out[:, Kc:Kc + R, :].reshape(N, R, H, W)
    return hm, rg


def centerdet_reference(x_nchw, params):
    """Pure-JAX f32 reference with identical semantics, for verification."""
    x = jnp.transpose(x_nchw, (0, 2, 3, 1)).astype(jnp.float32)
    wc = params["wc"]
    N, H, W, Cin = x.shape
    hidden = wc.shape[3]
    xp = jnp.pad(x, ((0, 0), (1, 1), (1, 1), (0, 0)))
    acc = jnp.zeros((N, H, W, hidden), jnp.float32)
    for dy in range(3):
        for dx in range(3):
            acc = acc + jnp.einsum("nhwc,cf->nhwf",
                                   xp[:, dy:dy + H, dx:dx + W, :], wc[dy, dx])
    feat = jnp.maximum(acc + params["bc"][0], 0.0)
    hm = jnp.einsum("nhwf,fk->nhwk", feat, params["whm"]) + params["bhm"][0]
    rg = jnp.einsum("nhwf,fk->nhwk", feat, params["wrg"]) + params["brg"][0]
    s = jax.nn.sigmoid(hm)
    sp = jnp.pad(s, ((0, 0), (1, 1), (1, 1), (0, 0)), constant_values=-jnp.inf)
    m = s
    for dy in range(3):
        for dx in range(3):
            m = jnp.maximum(m, sp[:, dy:dy + H, dx:dx + W, :])
    return (jnp.transpose(m, (0, 3, 1, 2)),
            jnp.transpose(rg, (0, 3, 1, 2)))


if __name__ == "__main__":
    N, Cin, H, W = 4, 4, 16, 16
    hidden, num_classes, reg_ch = 8, 4, 4

    def snap(a):
        # Keep test values exactly bf16-representable so feeding bf16 into the
        # MXU (f32 accumulation) stays very close to the f32 reference.
        return a.astype(jnp.bfloat16).astype(jnp.float32)

    key = jax.random.PRNGKey(0)
    ks = jax.random.split(key, 7)
    params = {
        "wc":  snap(jax.random.normal(ks[0], (3, 3, Cin, hidden), jnp.float32) * 0.2),
        "bc":  snap(jax.random.normal(ks[1], (1, hidden), jnp.float32) * 0.1),
        "whm": snap(jax.random.normal(ks[2], (hidden, num_classes), jnp.float32) * 0.2),
        "bhm": snap(jax.random.normal(ks[3], (1, num_classes), jnp.float32) * 0.1),
        "wrg": snap(jax.random.normal(ks[4], (hidden, reg_ch), jnp.float32) * 0.2),
        "brg": snap(jax.random.normal(ks[5], (1, reg_ch), jnp.float32) * 0.1),
    }
    x = snap(jax.random.normal(ks[6], (N, Cin, H, W), jnp.float32))

    fwd = jax.jit(centerdet_forward)
    hm, rg = jax.block_until_ready(fwd(x, params))
    hm_exp, rg_exp = centerdet_reference(x, params)

    assert hm.shape == (N, num_classes, H, W) and rg.shape == (N, reg_ch, H, W)
    # Tolerance accounts for bf16 MXU inputs (f32 accumulation) in the kernel
    # vs the all-f32 reference.
    assert np.allclose(np.asarray(hm), np.asarray(hm_exp), rtol=1e-2, atol=1e-2)
    assert np.allclose(np.asarray(rg), np.asarray(rg_exp), rtol=1e-2, atol=1e-2)

    print("KERNEL_OK")
</pallas_src>

<mosaic_0001>
module attributes {stable_mosaic.version = 11 : i64} {
  func.func @_centerdet_kernel(%arg0: i32, %arg1: memref<2x8x256xf32, #tpu.memory_space<vmem>>, %arg2: memref<2x512xi32, #tpu.memory_space<vmem>>, %arg3: memref<3x8x24xbf16, #tpu.memory_space<vmem>>, %arg4: memref<8x1xf32, #tpu.memory_space<vmem>>, %arg5: memref<8x8xbf16, #tpu.memory_space<vmem>>, %arg6: memref<8x1xf32, #tpu.memory_space<vmem>>, %arg7: memref<2x8x256xf32, #tpu.memory_space<vmem>>) attributes {dimension_semantics = [#tpu.dimension_semantics<parallel>], iteration_bounds = array<i64: 2>, scalar_prefetch = 0 : i64, scratch_operands = 0 : i64, tpu.core_type = #tpu.core_type<tc>, window_params = [{transform_indices = @transform_0, window_bounds = array<i64: 2, 8, 256>}, {pipeline_mode = #tpu.pipeline_mode<synchronous>, transform_indices = @transform_1, window_bounds = array<i64: 2, 512>}, {pipeline_mode = #tpu.pipeline_mode<synchronous>, transform_indices = @transform_2, window_bounds = array<i64: 3, 8, 24>}, {pipeline_mode = #tpu.pipeline_mode<synchronous>, transform_indices = @transform_3, window_bounds = array<i64: 8, 1>}, {pipeline_mode = #tpu.pipeline_mode<synchronous>, transform_indices = @transform_4, window_bounds = array<i64: 8, 8>}, {pipeline_mode = #tpu.pipeline_mode<synchronous>, transform_indices = @transform_5, window_bounds = array<i64: 8, 1>}, {transform_indices = @transform_6, window_bounds = array<i64: 2, 8, 256>}]} {
    %c0 = arith.constant 0 : index
    %c0_0 = arith.constant 0 : index
    %c0_1 = arith.constant 0 : index
    %0 = vector.load %arg1[%c0, %c0_0, %c0_1] : memref<2x8x256xf32, #tpu.memory_space<vmem>>, vector<1x8x256xf32>
    %1 = vector.shape_cast %0 : vector<1x8x256xf32> to vector<8x256xf32>
    %c1 = arith.constant 1 : index
    %c0_2 = arith.constant 0 : index
    %c0_3 = arith.constant 0 : index
    %2 = vector.load %arg1[%c1, %c0_2, %c0_3] : memref<2x8x256xf32, #tpu.memory_space<vmem>>, vector<1x8x256xf32>
    %3 = vector.shape_cast %2 : vector<1x8x256xf32> to vector<8x256xf32>
    %4 = tpu.concatenate %1, %3 in 1 : vector<8x256xf32>, vector<8x256xf32> -> vector<8x512xf32>
    %c0_4 = arith.constant 0 : index
    %c0_5 = arith.constant 0 : index
    %5 = vector.load %arg2[%c0_4, %c0_5] : memref<2x512xi32, #tpu.memory_space<vmem>>, vector<1x512xi32>
    %c1_6 = arith.constant 1 : index
    %c0_7 = arith.constant 0 : index
    %6 = vector.load %arg2[%c1_6, %c0_7] : memref<2x512xi32, #tpu.memory_space<vmem>>, vector<1x512xi32>
    %c1_i32 = arith.constant 1 : i32
    %7 = vector.broadcast %c1_i32 : i32 to vector<1x512xi32>
    %8 = arith.cmpi sge, %5, %7 : vector<1x512xi32>
    %c14_i32 = arith.constant 14 : i32
    %9 = vector.broadcast %c14_i32 : i32 to vector<1x512xi32>
    %10 = arith.cmpi sle, %5, %9 : vector<1x512xi32>
    %c1_i32_8 = arith.constant 1 : i32
    %11 = vector.broadcast %c1_i32_8 : i32 to vector<1x512xi32>
    %12 = arith.cmpi sge, %6, %11 : vector<1x512xi32>
    %c14_i32_9 = arith.constant 14 : i32
    %13 = vector.broadcast %c14_i32_9 : i32 to vector<1x512xi32>
    %14 = arith.cmpi sle, %6, %13 : vector<1x512xi32>
    %15 = arith.andi %8, %12 : vector<1x512xi1>
    %16 = vector.shape_cast %15 : vector<1x512xi1> to vector<1x512xi1>
    %17 = vector.broadcast %16 : vector<1x512xi1> to vector<8x512xi1>
    %18 = vector.shape_cast %8 : vector<1x512xi1> to vector<1x512xi1>
    %19 = vector.broadcast %18 : vector<1x512xi1> to vector<8x512xi1>
    %20 = arith.andi %8, %14 : vector<1x512xi1>
    %21 = vector.shape_cast %20 : vector<1x512xi1> to vector<1x512xi1>
    %22 = vector.broadcast %21 : vector<1x512xi1> to vector<8x512xi1>
    %23 = vector.shape_cast %12 : vector<1x512xi1> to vector<1x512xi1>
    %24 = vector.broadcast %23 : vector<1x512xi1> to vector<8x512xi1>
    %25 = vector.shape_cast %14 : vector<1x512xi1> to vector<1x512xi1>
    %26 = vector.broadcast %25 : vector<1x512xi1> to vector<8x512xi1>
    %27 = arith.andi %10, %12 : vector<1x512xi1>
    %28 = vector.shape_cast %27 : vector<1x512xi1> to vector<1x512xi1>
    %29 = vector.broadcast %28 : vector<1x512xi1> to vector<8x512xi1>
    %30 = vector.shape_cast %10 : vector<1x512xi1> to vector<1x512xi1>
    %31 = vector.broadcast %30 : vector<1x512xi1> to vector<8x512xi1>
    %32 = arith.andi %10, %14 : vector<1x512xi1>
    %33 = vector.shape_cast %32 : vector<1x512xi1> to vector<1x512xi1>
    %34 = vector.broadcast %33 : vector<1x512xi1> to vector<8x512xi1>
    %35 = vector.shape_cast %12 : vector<1x512xi1> to vector<1x512xi1>
    %36 = vector.broadcast %35 : vector<1x512xi1> to vector<8x512xi1>
    %37 = vector.shape_cast %14 : vector<1x512xi1> to vector<1x512xi1>
    %38 = vector.broadcast %37 : vector<1x512xi1> to vector<8x512xi1>
    %39 = vector.shape_cast %8 : vector<1x512xi1> to vector<1x512xi1>
    %40 = vector.broadcast %39 : vector<1x512xi1> to vector<8x512xi1>
    %41 = vector.shape_cast %10 : vector<1x512xi1> to vector<1x512xi1>
    %42 = vector.broadcast %41 : vector<1x512xi1> to vector<8x512xi1>
    %c17_i32 = arith.constant 17 : i32
    %43 = tpu.dynamic_rotate %4 by %c17_i32 dim 1 : vector<8x512xf32>, i32 -> vector<8x512xf32>
    %cst = arith.constant 0.000000e+00 : f32
    %44 = vector.broadcast %cst : f32 to vector<8x512xf32>
    %45 = arith.select %17, %43, %44 : vector<8x512xi1>, vector<8x512xf32>
    %c16_i32 = arith.constant 16 : i32
    %46 = tpu.dynamic_rotate %4 by %c16_i32 dim 1 : vector<8x512xf32>, i32 -> vector<8x512xf32>
    %cst_10 = arith.constant 0.000000e+00 : f32
    %47 = vector.broadcast %cst_10 : f32 to vector<8x512xf32>
    %48 = arith.select %19, %46, %47 : vector<8x512xi1>, vector<8x512xf32>
    %c15_i32 = arith.constant 15 : i32
    %49 = tpu.dynamic_rotate %4 by %c15_i32 dim 1 : vector<8x512xf32>, i32 -> vector<8x512xf32>
    %cst_11 = arith.constant 0.000000e+00 : f32
    %50 = vector.broadcast %cst_11 : f32 to vector<8x512xf32>
    %51 = arith.select %22, %49, %50 : vector<8x512xi1>, vector<8x512xf32>
    %52 = tpu.concatenate %45, %48, %51 in 0 : vector<8x512xf32>, vector<8x512xf32>, vector<8x512xf32> -> vector<24x512xf32>
    %53 = arith.truncf %52 : vector<24x512xf32> to vector<24x512xbf16>
    %c0_12 = arith.constant 0 : index
    %c0_13 = arith.constant 0 : index
    %c0_14 = arith.constant 0 : index
    %54 = vector.load %arg3[%c0_12, %c0_13, %c0_14] : memref<3x8x24xbf16, #tpu.memory_space<vmem>>, vector<1x8x24xbf16>
    %55 = vector.shape_cast %54 : vector<1x8x24xbf16> to vector<8x24xbf16>
    %cst_15 = arith.constant dense<0.000000e+00> : vector<8x512xf32>
    %56 = tpu.matmul %55, %53, %cst_15 {dimension_numbers = #tpu.dot_dimension_numbers<[1], [0], [0], [1], [0, 0, 1, 1], [], []>} : vector<8x24xbf16>, vector<24x512xbf16>, vector<8x512xf32> -> vector<8x512xf32>
    %c1_i32_16 = arith.constant 1 : i32
    %57 = tpu.dynamic_rotate %4 by %c1_i32_16 dim 1 : vector<8x512xf32>, i32 -> vector<8x512xf32>
    %cst_17 = arith.constant 0.000000e+00 : f32
    %58 = vector.broadcast %cst_17 : f32 to vector<8x512xf32>
    %59 = arith.select %24, %57, %58 : vector<8x512xi1>, vector<8x512xf32>
    %c511_i32 = arith.constant 511 : i32
    %60 = tpu.dynamic_rotate %4 by %c511_i32 dim 1 : vector<8x512xf32>, i32 -> vector<8x512xf32>
    %cst_18 = arith.constant 0.000000e+00 : f32
    %61 = vector.broadcast %cst_18 : f32 to vector<8x512xf32>
    %62 = arith.select %26, %60, %61 : vector<8x512xi1>, vector<8x512xf32>
    %63 = tpu.concatenate %59, %4, %62 in 0 : vector<8x512xf32>, vector<8x512xf32>, vector<8x512xf32> -> vector<24x512xf32>
    %64 = arith.truncf %63 : vector<24x512xf32> to vector<24x512xbf16>
    %c1_19 = arith.constant 1 : index
    %c0_20 = arith.constant 0 : index
    %c0_21 = arith.constant 0 : index
    %65 = vector.load %arg3[%c1_19, %c0_20, %c0_21] : memref<3x8x24xbf16, #tpu.memory_space<vmem>>, vector<1x8x24xbf16>
    %66 = vector.shape_cast %65 : vector<1x8x24xbf16> to vector<8x24xbf16>
    %cst_22 = arith.constant dense<0.000000e+00> : vector<8x512xf32>
    %67 = tpu.matmul %66, %64, %cst_22 {dimension_numbers = #tpu.dot_dimension_numbers<[1], [0], [0], [1], [0, 0, 1, 1], [], []>} : vector<8x24xbf16>, vector<24x512xbf16>, vector<8x512xf32> -> vector<8x512xf32>
    %68 = arith.addf %56, %67 : vector<8x512xf32>
    %c497_i32 = arith.constant 497 : i32
    %69 = tpu.dynamic_rotate %4 by %c497_i32 dim 1 : vector<8x512xf32>, i32 -> vector<8x512xf32>
    %cst_23 = arith.constant 0.000000e+00 : f32
    %70 = vector.broadcast %cst_23 : f32 to vector<8x512xf32>
    %71 = arith.select %29, %69, %70 : vector<8x512xi1>, vector<8x512xf32>
    %c496_i32 = arith.constant 496 : i32
    %72 = tpu.dynamic_rotate %4 by %c496_i32 dim 1 : vector<8x512xf32>, i32 -> vector<8x512xf32>
    %cst_24 = arith.constant 0.000000e+00 : f32
    %73 = vector.broadcast %cst_24 : f32 to vector<8x512xf32>
    %74 = arith.select %31, %72, %73 : vector<8x512xi1>, vector<8x512xf32>
    %c495_i32 = arith.constant 495 : i32
    %75 = tpu.dynamic_rotate %4 by %c495_i32 dim 1 : vector<8x512xf32>, i32 -> vector<8x512xf32>
    %cst_25 = arith.constant 0.000000e+00 : f32
    %76 = vector.broadcast %cst_25 : f32 to vector<8x512xf32>
    %77 = arith.select %34, %75, %76 : vector<8x512xi1>, vector<8x512xf32>
    %78 = tpu.concatenate %71, %74, %77 in 0 : vector<8x512xf32>, vector<8x512xf32>, vector<8x512xf32> -> vector<24x512xf32>
    %79 = arith.truncf %78 : vector<24x512xf32> to vector<24x512xbf16>
    %c2 = arith.constant 2 : index
    %c0_26 = arith.constant 0 : index
    %c0_27 = arith.constant 0 : index
    %80 = vector.load %arg3[%c2, %c0_26, %c0_27] : memref<3x8x24xbf16, #tpu.memory_space<vmem>>, vector<1x8x24xbf16>
    %81 = vector.shape_cast %80 : vector<1x8x24xbf16> to vector<8x24xbf16>
    %cst_28 = arith.constant dense<0.000000e+00> : vector<8x512xf32>
    %82 = tpu.matmul %81, %79, %cst_28 {dimension_numbers = #tpu.dot_dimension_numbers<[1], [0], [0], [1], [0, 0, 1, 1], [], []>} : vector<8x24xbf16>, vector<24x512xbf16>, vector<8x512xf32> -> vector<8x512xf32>
    %83 = arith.addf %68, %82 : vector<8x512xf32>
    %c0_29 = arith.constant 0 : index
    %c0_30 = arith.constant 0 : index
    %84 = vector.load %arg4[%c0_29, %c0_30] : memref<8x1xf32, #tpu.memory_space<vmem>>, vector<8x1xf32>
    %85 = vector.broadcast %84 : vector<8x1xf32> to vector<8x512xf32>
    %86 = arith.addf %83, %85 : vector<8x512xf32>
    %cst_31 = arith.constant 0.000000e+00 : f32
    %87 = vector.broadcast %cst_31 : f32 to vector<8x512xf32>
    %88 = arith.maximumf %86, %87 : vector<8x512xf32>
    %c0_32 = arith.constant 0 : index
    %c0_33 = arith.constant 0 : index
    %89 = vector.load %arg5[%c0_32, %c0_33] : memref<8x8xbf16, #tpu.memory_space<vmem>>, vector<8x8xbf16>
    %90 = arith.truncf %88 : vector<8x512xf32> to vector<8x512xbf16>
    %cst_34 = arith.constant dense<0.000000e+00> : vector<8x512xf32>
    %91 = tpu.matmul %89, %90, %cst_34 {dimension_numbers = #tpu.dot_dimension_numbers<[1], [0], [0], [1], [0, 0, 1, 1], [], []>} : vector<8x8xbf16>, vector<8x512xbf16>, vector<8x512xf32> -> vector<8x512xf32>
    %c0_35 = arith.constant 0 : index
    %c0_36 = arith.constant 0 : index
    %92 = vector.load %arg6[%c0_35, %c0_36] : memref<8x1xf32, #tpu.memory_space<vmem>>, vector<8x1xf32>
    %93 = vector.broadcast %92 : vector<8x1xf32> to vector<8x512xf32>
    %94 = arith.addf %91, %93 : vector<8x512xf32>
    %95 = arith.negf %94 : vector<8x512xf32>
    %96 = math.exp %95 : vector<8x512xf32>
    %cst_37 = arith.constant 1.000000e+00 : f32
    %97 = vector.broadcast %cst_37 : f32 to vector<8x512xf32>
    %98 = arith.addf %97, %96 : vector<8x512xf32>
    %99 = arith.divf %97, %98 : vector<8x512xf32>
    %c1_i32_38 = arith.constant 1 : i32
    %100 = tpu.dynamic_rotate %99 by %c1_i32_38 dim 1 : vector<8x512xf32>, i32 -> vector<8x512xf32>
    %cst_39 = arith.constant 0xFF800000 : f32
    %101 = vector.broadcast %cst_39 : f32 to vector<8x512xf32>
    %102 = arith.select %36, %100, %101 : vector<8x512xi1>, vector<8x512xf32>
    %103 = arith.maximumf %99, %102 : vector<8x512xf32>
    %c511_i32_40 = arith.constant 511 : i32
    %104 = tpu.dynamic_rotate %99 by %c511_i32_40 dim 1 : vector<8x512xf32>, i32 -> vector<8x512xf32>
    %cst_41 = arith.constant 0xFF800000 : f32
    %105 = vector.broadcast %cst_41 : f32 to vector<8x512xf32>
    %106 = arith.select %38, %104, %105 : vector<8x512xi1>, vector<8x512xf32>
    %107 = arith.maximumf %103, %106 : vector<8x512xf32>
    %c16_i32_42 = arith.constant 16 : i32
    %108 = tpu.dynamic_rotate %107 by %c16_i32_42 dim 1 : vector<8x512xf32>, i32 -> vector<8x512xf32>
    %cst_43 = arith.constant 0xFF800000 : f32
    %109 = vector.broadcast %cst_43 : f32 to vector<8x512xf32>
    %110 = arith.select %40, %108, %109 : vector<8x512xi1>, vector<8x512xf32>
    %111 = arith.maximumf %107, %110 : vector<8x512xf32>
    %c496_i32_44 = arith.constant 496 : i32
    %112 = tpu.dynamic_rotate %107 by %c496_i32_44 dim 1 : vector<8x512xf32>, i32 -> vector<8x512xf32>
    %cst_45 = arith.constant 0xFF800000 : f32
    %113 = vector.broadcast %cst_45 : f32 to vector<8x512xf32>
    %114 = arith.select %42, %112, %113 : vector<8x512xi1>, vector<8x512xf32>
    %115 = arith.maximumf %111, %114 : vector<8x512xf32>
    %116 = tpu.iota {dimensions = array<i32: 0>} : vector<8x512xi32>
    %c4_i32 = arith.constant 4 : i32
    %117 = vector.broadcast %c4_i32 : i32 to vector<8x512xi32>
    %118 = arith.cmpi slt, %116, %117 : vector<8x512xi32>
    %119 = arith.select %118, %115, %94 : vector<8x512xi1>, vector<8x512xf32>
    %120 = vector.extract_strided_slice %119 {offsets = [0, 0], sizes = [8, 256], strides = [1, 1]} : vector<8x512xf32> to vector<8x256xf32>
    %c0_46 = arith.constant 0 : index
    %c0_47 = arith.constant 0 : index
    %c0_48 = arith.constant 0 : index
    %121 = vector.load %arg7[%c0_46, %c0_47, %c0_48] : memref<2x8x256xf32, #tpu.memory_space<vmem>>, vector<1x8x256xf32>
    %122 = vector.shape_cast %121 : vector<1x8x256xf32> to vector<8x256xf32>
    %123 = vector.shape_cast %120 : vector<8x256xf32> to vector<1x8x256xf32>
    tpu.vector_store %arg7[%c0_46, %c0_47, %c0_48], %123 {strides = array<i32>} : memref<2x8x256xf32, #tpu.memory_space<vmem>>, vector<1x8x256xf32>,
    %124 = vector.extract_strided_slice %119 {offsets = [0, 256], sizes = [8, 256], strides = [1, 1]} : vector<8x512xf32> to vector<8x256xf32>
    %c1_49 = arith.constant 1 : index
    %c0_50 = arith.constant 0 : index
    %c0_51 = arith.constant 0 : index
    %125 = vector.load %arg7[%c1_49, %c0_50, %c0_51] : memref<2x8x256xf32, #tpu.memory_space<vmem>>, vector<1x8x256xf32>
    %126 = vector.shape_cast %125 : vector<1x8x256xf32> to vector<8x256xf32>
    %127 = vector.shape_cast %124 : vector<8x256xf32> to vector<1x8x256xf32>
    tpu.vector_store %arg7[%c1_49, %c0_50, %c0_51], %127 {strides = array<i32>} : memref<2x8x256xf32, #tpu.memory_space<vmem>>, vector<1x8x256xf32>,
    return
  }
  func.func @transform_0(%arg0: i32) -> (i32, i32, i32) {
    %c0_i32 = arith.constant 0 : i32
    %c0_i32_0 = arith.constant 0 : i32
    %c0_i32_1 = arith.constant 0 : i32
    return %arg0, %c0_i32, %c0_i32_0 : i32, i32, i32
  }
  func.func @transform_1(%arg0: i32) -> (i32, i32) {
    %c0_i32 = arith.constant 0 : i32
    %c0_i32_0 = arith.constant 0 : i32
    %c0_i32_1 = arith.constant 0 : i32
    return %c0_i32, %c0_i32_0 : i32, i32
  }
  func.func @transform_2(%arg0: i32) -> (i32, i32, i32) {
    %c0_i32 = arith.constant 0 : i32
    %c0_i32_0 = arith.constant 0 : i32
    %c0_i32_1 = arith.constant 0 : i32
    %c0_i32_2 = arith.constant 0 : i32
    return %c0_i32, %c0_i32_0, %c0_i32_1 : i32, i32, i32
  }
  func.func @transform_3(%arg0: i32) -> (i32, i32) {
    %c0_i32 = arith.constant 0 : i32
    %c0_i32_0 = arith.constant 0 : i32
    %c0_i32_1 = arith.constant 0 : i32
    return %c0_i32, %c0_i32_0 : i32, i32
  }
  func.func @transform_4(%arg0: i32) -> (i32, i32) {
    %c0_i32 = arith.constant 0 : i32
    %c0_i32_0 = arith.constant 0 : i32
    %c0_i32_1 = arith.constant 0 : i32
    return %c0_i32, %c0_i32_0 : i32, i32
  }
  func.func @transform_5(%arg0: i32) -> (i32, i32) {
    %c0_i32 = arith.constant 0 : i32
    %c0_i32_0 = arith.constant 0 : i32
    %c0_i32_1 = arith.constant 0 : i32
    return %c0_i32, %c0_i32_0 : i32, i32
  }
  func.func @transform_6(%arg0: i32) -> (i32, i32, i32) {
    %c0_i32 = arith.constant 0 : i32
    %c0_i32_0 = arith.constant 0 : i32
    %c0_i32_1 = arith.constant 0 : i32
    return %arg0, %c0_i32, %c0_i32_0 : i32, i32, i32
  }
}

</mosaic_0001>

<bundles_post_ra>
// kernel: tile.10
= control target key start
LH: loop header
LB: loop body
LE: loop exit
PB: predicated region body
PF: predicated region fallthrough
CT: control target
= control target key end

     0   :  { %s7_s6 = smov 3  ;;  %s21_s9 = smov 3  ;;  %vm4_vm0 = vcmask 130048   ;;  %vm11_vm1 = vcmask 1048448   ;;  %vm18_vm2 = vcmask 917248   ;;  %vm25_vm3 = vcmask 786048   ;;  %s119_s0 = inlined_call_operand.vmem [shape: s32[16,16], index: 0, kind: input, shape index: {}]   ;;  %s120_s1 = inlined_call_operand.vmem [shape: s32[256], index: 1, kind: output, shape index: {}]  }
   0x1   :  { %v61_v0 = vld [vmem:[%s119_s0 + $0x7] ss:$8 sm:%s7_s6]   ;;  %s75_s10 = smov 112   ;;  %v63_v1 = vld [vmem:[%s119_s0 + $0x5] ss:$8 sm:%s21_s9]   ;;  %s14_s13 = smov 3 }
   0x2   :  { %9 = vrot.lane.b32.xlu0 %v61_v0, %s75_s10  ;;  %s76_s14 = smov 80   ;;  %v62_v2 = vld [vmem:[%s119_s0 + $0x6] ss:$8 sm:%s14_s13]   ;;  %s28_s17 = smov 3  ;;  %vm32_vm4 = vcmask 654848   ;;  %vm39_vm5 = vcmask 523648  }
   0x3   :  { %23 = vrot.lane.b32.xlu1 %v63_v1, %s76_s14  ;;  %v64_v3 = vld [vmem:[%s119_s0 + $0x4] ss:$8 sm:%s28_s17]   ;;  %s35_s20 = smov 3  ;;  %s42_s21 = smov 3  ;;  %vm46_vm6 = vcmask 392448   ;;  %vm53_vm7 = vcmask 261248  }
   0x4   :  { %s77_s22 = smov 96   ;;  %s78_s23 = smov 64   ;;  %v65_v4 = vld [vmem:[%s119_s0 + $0x3] ss:$8 sm:%s35_s20]   ;;  %v66_v5 = vld [vmem:[%s119_s0 + $0x2] ss:$8 sm:%s42_s21]  }
   0x5   :  { %s2_s26 = smov 3  ;;  %s49_s29 = smov 3 }
   0x6   :  { %16 = vrot.lane.b32.xlu0 %v62_v2, %s77_s22  ;;  %v3_v6 = vld [vmem:[%s119_s0] ss:$8 sm:%s2_s26]   ;;  %s79_s3 = smov 48   ;;  %s80_s4 = smov 32  }
   0x7   :  { %30 = vrot.lane.b32.xlu1 %v64_v3, %s78_s23  ;;  %5 = vst.msk [vmem:[#allocation0] sm:$0x3] %vm4_vm0, %v3_v6   ;;  %v67_v7 = vld [vmem:[%s119_s0 + $0x1] ss:$8 sm:%s49_s29]   ;;  %s81_s0 = smov 16  }
   0xa   :  { %37 = vrot.lane.b32.xlu0 %v65_v4, %s79_s3 }
   0xb   :  { %44 = vrot.lane.b32.xlu1 %v66_v5, %s80_s4 }
   0xe   :  { %51 = vrot.lane.b32.xlu0 %v67_v7, %s81_s0 }
  0x74   :  { %v10_v8 = vpop.permute.xlu0 %9  }
  0x75   :  { %12 = vst.msk [vmem:[#allocation0] sm:$0x3] %vm11_vm1, %v10_v8   ;;  %v24_v9 = vpop.permute.xlu1 %23  }
  0x78   :  { %v17_v10 = vpop.permute.xlu0 %16  }
  0x79   :  { %19 = vst.msk [vmem:[#allocation0] sm:$0x3] %vm18_vm2, %v17_v10   ;;  %v31_v11 = vpop.permute.xlu1 %30  }
  0x7a   :  { %26 = vst.msk [vmem:[#allocation0] sm:$0x3] %vm25_vm3, %v24_v9  }
  0x7b   :  { %33 = vst.msk [vmem:[#allocation0] sm:$0x3] %vm32_vm4, %v31_v11  }
  0x7c   :  { %v38_v12 = vpop.permute.xlu0 %37  }
  0x7d   :  { %40 = vst.msk [vmem:[#allocation0] sm:$0x3] %vm39_vm5, %v38_v12   ;;  %v45_v13 = vpop.permute.xlu1 %44  }
  0x7e   :  { %47 = vst.msk [vmem:[#allocation0] sm:$0x3] %vm46_vm6, %v45_v13  }
  0x80   :  { %v52_v14 = vpop.permute.xlu0 %51  }
  0x81   :  { %54 = vst.msk [vmem:[#allocation0] sm:$0x3] %vm53_vm7, %v52_v14  }
  0x88   :  { %v58_v15 = vld [vmem:[#allocation0] sm:$0x3] }
  0x89   :  { %60 = vst [vmem:[%s120_s1] sm:$0x3] %v58_v15 }

// kernel: tile.17
= control target key start
LH: loop header
LB: loop body
LE: loop exit
PB: predicated region body
PF: predicated region fallthrough
CT: control target
= control target key end

     0   :  { %s89_s8 = smov 112   ;;  %s90_s11 = smov 80   ;;  %vm3_vm0 = vcmask 130048   ;;  %vm9_vm1 = vcmask 1048448   ;;  %vm15_vm2 = vcmask 917248   ;;  %vm21_vm3 = vcmask 786048   ;;  %s142_s0 = inlined_call_operand.vmem [shape: s32[32,16], index: 0, kind: input, shape index: {}]   ;;  %s143_s1 = inlined_call_operand.vmem [shape: s32[1,512], index: 1, kind: output, shape index: {}]  }
   0x1   :  { %v72_v0 = vld [vmem:[%s142_s0 + $0x7] ss:$8 sm:$0xf]   ;;  %v74_v1 = vld [vmem:[%s142_s0 + $0x5] ss:$8 sm:$0xf]  }
   0x2   :  { %7 = vrot.lane.b32.xlu0 %v72_v0, %s89_s8  ;;  %19 = vrot.lane.b32.xlu1 %v74_v1, %s90_s11  ;;  %v73_v2 = vld [vmem:[%s142_s0 + $0x6] ss:$8 sm:$0xf]   ;;  %v75_v3 = vld [vmem:[%s142_s0 + $0x4] ss:$8 sm:$0xf]  }
   0x3   :  { %s91_s16 = smov 96   ;;  %v2_v4 = vld [vmem:[%s142_s0] ss:$8 sm:$0xf]   ;;  %s92_s19 = smov 64   ;;  %vm27_vm4 = vcmask 654848  }
   0x4   :  { %v76_v5 = vld [vmem:[%s142_s0 + $0x3] ss:$8 sm:$0xf]   ;;  %4 = vst.msk [vmem:[#allocation0] ss:$8 sm:$0xf] %vm3_vm0, %v2_v4  }
   0x5   :  { %v77_v6 = vld [vmem:[%s142_s0 + $0x2] ss:$8 sm:$0xf]   ;;  %s93_s24 = smov 48   ;;  %s94_s25 = smov 32   ;;  %vm33_vm5 = vcmask 523648  }
   0x6   :  { %13 = vrot.lane.b32.xlu0 %v73_v2, %s91_s16  ;;  %25 = vrot.lane.b32.xlu1 %v75_v3, %s92_s19  ;;  %v78_v7 = vld [vmem:[%s142_s0 + $0x1] ss:$8 sm:$0xf]   ;;  %s95_s0 = smov 16   ;;  %vm39_vm6 = vcmask 392448   ;;  %vm45_vm7 = vcmask 261248  }
   0xa   :  { %31 = vrot.lane.b32.xlu0 %v76_v5, %s93_s24  ;;  %37 = vrot.lane.b32.xlu1 %v77_v6, %s94_s25 }
   0xe   :  { %43 = vrot.lane.b32.xlu0 %v78_v7, %s95_s0 }
  0x74   :  { %v8_v8 = vpop.permute.xlu0 %7   ;;  %v20_v9 = vpop.permute.xlu1 %19  }
  0x75   :  { %10 = vst.msk [vmem:[#allocation0] ss:$8 sm:$0xf] %vm9_vm1, %v8_v8  }
  0x78   :  { %v14_v10 = vpop.permute.xlu0 %13   ;;  %v26_v11 = vpop.permute.xlu1 %25  }
  0x79   :  { %16 = vst.msk [vmem:[#allocation0] ss:$8 sm:$0xf] %vm15_vm2, %v14_v10  }
  0x7a   :  { %22 = vst.msk [vmem:[#allocation0] ss:$8 sm:$0xf] %vm21_vm3, %v20_v9  }
  0x7b   :  { %28 = vst.msk [vmem:[#allocation0] ss:$8 sm:$0xf] %vm27_vm4, %v26_v11  }
  0x7c   :  { %v32_v12 = vpop.permute.xlu0 %31   ;;  %v38_v13 = vpop.permute.xlu1 %37  }
  0x7d   :  { %34 = vst.msk [vmem:[#allocation0] ss:$8 sm:$0xf] %vm33_vm5, %v32_v12  }
  0x7e   :  { %40 = vst.msk [vmem:[#allocation0] ss:$8 sm:$0xf] %vm39_vm6, %v38_v13  }
  0x80   :  { %v44_v14 = vpop.permute.xlu0 %43  }
  0x81   :  { %46 = vst.msk [vmem:[#allocation0] ss:$8 sm:$0xf] %vm45_vm7, %v44_v14  }
  0x88   :  { %v50_v15 = vld [vmem:[#allocation0] sm:$0x1]  ;;  %v54_v16 = vld [vmem:[#allocation0 + $0x8] sm:$0x1]  ;;  %v59_v17 = vld [vmem:[#allocation0 + $0x10] sm:$0x1] }
  0x89   :  { %52 = vst [vmem:[%s143_s1] sm:$0x1] %v50_v15  ;;  %79 = vst [vmem:[%s143_s1 + $0x1] sm:$0x1] %v54_v16  ;;  %v65_v18 = vld [vmem:[#allocation0 + $0x18] sm:$0x1] }
  0x8a   :  { %80 = vst [vmem:[%s143_s1 + $0x2] sm:$0x1] %v59_v17  ;;  %81 = vst [vmem:[%s143_s1 + $0x3] sm:$0x1] %v65_v18 }

// kernel: centerdet_forward.1
= control target key start
LH: loop header
LB: loop body
LE: loop exit
PB: predicated region body
PF: predicated region fallthrough
CT: control target
= control target key end

     0   :  { %s1453_s21 = smov 0   ;;  %s2142_s0 = inlined_call_operand.vmem [shape: f32[4,8,256], index: 0, kind: input, shape index: {}]   ;;  %s2143_s1 = inlined_call_operand.vmem [shape: s32[2,512], index: 1, kind: input, shape index: {}]   ;;  %s2144_s2 = inlined_call_operand.vmem [shape: bf16[3,8,24], index: 2, kind: input, shape index: {}]   ;;  %s2145_s3 = inlined_call_operand.vmem [shape: f32[8,1], index: 3, kind: input, shape index: {}]   ;;  %s2146_s4 = inlined_call_operand.vmem [shape: bf16[8,8], index: 4, kind: input, shape index: {}]   ;;  %s2147_s5 = inlined_call_operand.vmem [shape: f32[8,1], index: 5, kind: input, shape index: {}]   ;;  %s2148_s6 = inlined_call_operand.vmem [shape: f32[4,8,256], index: 6, kind: output, shape index: {}]  }
   0x1 LB: > { %s1206_s22 = sadd.s32 4294967295, %s1406_s21   ;;  %p1210_p0 = scmp.ge.s32.totalorder %s1406_s21, 1  ;;  %s1406_s21 = sphi %s1453_s21, %s16_s21  }
   0x2   : > { %p214_p1 = scmp.lt.s32.totalorder %s1406_s21, 3 }
   0x4   : > { %p215_p2 = pnand %p1210_p0, %p214_p1 }
   0x5   : > { %s1211_s23 = sshll.u32 (!%p215_p2), %s1206_s22, 1  ;;  %v1408_v0 = vmov (!%p215_p2), 0   ;;  %s1409_s28 = smov (!%p215_p2), 127   ;;  %v909_v7 = vld [vmem:[%s2145_s3] sm:$0xff] (!%p215_p2)  ;;  %v275_v8 = vlaneseq (!%p215_p2)  ;;  %v2169_v28 = vmov (!%p215_p2), 0  ;;  %v2171_v31 = vmov (!%p215_p2), 0 }
   0x6   : > { %218 = sbr.rel (%p215_p2) target bundleno = 918 (0x396), region = 44  ;;  %p247_p3 = scmp.lt.s32.totalorder (!%p215_p2), %s1211_s23, 3  ;;  %600 = vmatprep.mubr.bf16.mxu0 (!%p215_p2), %v1408_v0  ;;  %641 = vmatprep.mubr.bf16.mxu1 (!%p215_p2), %v1408_v0  ;;  %v1499_v9 = vld [vmem:[%s2143_s1 + $0x1] ss:$2 sm:$0xf] (!%p215_p2)  ;;  %v2173_v32 = vmov (!%p215_p2), 0 }
   0x7   : > { %1382 = vset.pattern.permute.xlu0 (!%p215_p2), %v1408_v0  ;;  %1383 = vset.pattern.permute.xlu1 (!%p215_p2), %v1408_v0  ;;  %s1410_s29 = smov (!%p215_p2), 1   ;;  %s1411_s30 = smov (!%p215_p2), 17   ;;  %v1501_v10 = vshrl.u32 (!%p215_p2), %v275_v8, 7  ;;  %vm271_vm0 = vcmp.ge.s32.totalorder (!%p215_p2), %v1499_v9, 1  ;;  %vm272_vm1 = vcmp.le.s32.totalorder (!%p215_p2), %v1499_v9, 14  ;;  %v1514_v14 = vand.u32 (!%p215_p2), 127, %v275_v8 }
   0x8   : > { %s1412_s7 = smov (!%p215_p2), 16   ;;  %s1413_s8 = smov (!%p215_p2), 15   ;;  %v266_v11 = vld [vmem:[%s2143_s1] ss:$2 sm:$0xf] (!%p215_p2)  ;;  %v338_v15 = vsel (!%p215_p2), %vm271_vm0, 1, %v1408_v0 }
   0x9   : > { %s1414_s9 = smov (!%p215_p2), 113   ;;  %s1415_s10 = smov (!%p215_p2), 112   ;;  %v1509_v12 = vsub.s32 (!%p215_p2), 1, %v1501_v10  ;;  %v1512_v13 = vsub.s32 (!%p215_p2), 3, %v1501_v10  ;;  %v1520_v16 = vsub.s32 (!%p215_p2), 0, %v1501_v10  ;;  %vm269_vm2 = vcmp.ge.s32.totalorder (!%p215_p2), %v266_v11, 1 }
   0xa   : > { %s1416_s11 = smov (!%p215_p2), 111   ;;  %v359_v17 = vsel (!%p215_p2), %vm272_vm1, 1, %v1408_v0  ;;  %v1527_v19 = vsub.s32 (!%p215_p2), 2, %v1501_v10  ;;  %vm316_vm3 = vmand (!%p215_p2), %vm269_vm2, %vm272_vm1  ;;  %vm2152_vm5 = vcmp.lt.s32.totalorder (!%p215_p2), %v1514_v14, 127  ;;  %vm2151_vm6 = vcmp.lt.s32.totalorder (!%p215_p2), %v1514_v14, 1 }
   0xb   : > { %v367_v18 = vrot.slane (!%p215_p2), %v359_v17, %v1509_v12  ;;  %v375_v20 = vrot.slane (!%p215_p2), %v359_v17, %v1512_v13  ;;  %v346_v21 = vrot.slane (!%p215_p2), %v338_v15, %v1509_v12  ;;  %v342_v22 = vrot.slane (!%p215_p2), %v338_v15, %v1520_v16  ;;  %vm273_vm4 = vmand (!%p215_p2), %vm269_vm2, %vm271_vm0 }
   0xc   : > { %v354_v23 = vrot.slane (!%p215_p2), %v338_v15, %v1512_v13  ;;  %v363_v24 = vrot.slane (!%p215_p2), %v359_v17, %v1520_v16  ;;  %v350_v25 = vrot.slane (!%p215_p2), %v338_v15, %v1527_v19  ;;  %v1542_v26 = vsel (!%p215_p2), %vm316_vm3, 1, %v1408_v0 }
   0xd   : > { %s2338_s23 = smov (!%p247_p3, %s1211_s23), 3  ;;  %v1545_v27 = vsel %vm269_vm2, 1, %v1408_v0  ;;  %vm1547_vm7 = vcmp.eq.s32.totalorder %v367_v18, 1  ;;  %v371_v29 = vrot.slane %v359_v17, %v1527_v19  ;;  %v1553_v30 = vsel %vm273_vm4, 1, %v1408_v0 }
   0xe   : > { %s1282_s24 = sshll.u32 %s2338_s23, 4  ;;  %v2170_v28 = vsel %vm1547_vm7, 4294967295, %v2169_v28  ;;  %vm270_vm8 = vcmp.le.s32.totalorder %v266_v11, 14  ;;  %vm1555_vm9 = vcmp.eq.s32.totalorder %v375_v20, 1  ;;  %vm1559_vm10 = vcmp.eq.s32.totalorder %v346_v21, 1 }
   0xf   : > { %s251_s27 = scalar_lea.vmem %s2142_s0, %s1282_s24  ;;  %v2172_v31 = vsel %vm1555_vm9, 4294967295, %v2171_v31  ;;  %v2174_v32 = vsel %vm1559_vm10, 4294967295, %v2173_v32  ;;  %vm1563_vm11 = vcmp.eq.s32.totalorder %v342_v22, 1  ;;  %v2175_v33 = vmov 0  ;;  %vm1602_vm2 = vmand %vm270_vm8, %vm272_vm1 }
  0x10   : > { %v1473_v1 = vld [vmem:[%s251_s27] sm:$0xff]  ;;  %v1475_v2 = vld [vmem:[%s251_s27 + $0x8] sm:$0xff]  ;;  %v1477_v3 = vld [vmem:[%s251_s27 + $0x10] sm:$0xff]  ;;  %v2176_v33 = vsel %vm1563_vm11, 4294967295, %v2175_v33  ;;  %vm1567_vm12 = vcmp.eq.s32.totalorder %v354_v23, 1  ;;  %v2177_v34 = vmov 0  ;;  %v333_v36 = vrot.slane %v1542_v26, %v1512_v13 }
  0x11   : > { %v1312_v4 = vpack.i.bf16 %v1475_v2, %v1473_v1  ;;  %v1481_v5 = vld [vmem:[%s251_s27 + $0x18] sm:$0xff]  ;;  %v2178_v34 = vsel %vm1567_vm12, 4294967295, %v2177_v34  ;;  %vm1571_vm13 = vcmp.eq.s32.totalorder %v363_v24, 1  ;;  %v2179_v35 = vmov 0 }
  0x12   : > { %v1317_v6 = vpack.i.bf16 %v1481_v5, %v1477_v3  ;;  %v2180_v35 = vsel %vm1571_vm13, 4294967295, %v2179_v35  ;;  %v303_v37 = vrot.slane %v1545_v27, %v1509_v12  ;;  %v311_v38 = vrot.slane %v1545_v27, %v1512_v13 }
  0x13   : > { %1313 = vrot.lane.b32.xlu1 %v1312_v4, %s1409_s28  ;;  %1303 = vrot.lane.b32.xlu0 %v1312_v4, %s1410_s29  ;;  %vm1583_vm14 = vcmp.eq.s32.totalorder %v350_v25, 1  ;;  %v2181_v41 = vmov 0  ;;  %v282_v42 = vrot.slane %v1553_v30, %v1509_v12  ;;  %v278_v43 = vrot.slane %v1553_v30, %v1520_v16 }
  0x14   : > { %v2182_v41 = vsel %vm1583_vm14, 4294967295, %v2181_v41  ;;  %v299_v44 = vrot.slane %v1545_v27, %v1520_v16  ;;  %v1595_v45 = vsel %vm270_vm8, 1, %v1408_v0  ;;  %vm2149_vm3 = vmmov 1  }
  0x15   : > { %vm1609_vm4 = vmpackc.low %vm2149_vm3, %vm1559_vm10  ;;  %v325_v52 = vrot.slane %v1542_v26, %v1509_v12  ;;  %v290_v53 = vrot.slane %v1553_v30, %v1512_v13  ;;  %v286_v54 = vrot.slane %v1553_v30, %v1527_v19  ;;  %v307_v55 = vrot.slane %v1545_v27, %v1527_v19 }
  0x16   : > { %vm1628_vm15 = vcmp.eq.s32.totalorder %v371_v29, 1  ;;  %v2187_v58 = vmov 0  ;;  %v321_v59 = vrot.slane %v1542_v26, %v1520_v16  ;;  %v329_v60 = vrot.slane %v1542_v26, %v1527_v19  ;;  %vm1639_vm3 = vmand %vm270_vm8, %vm271_vm0 }
  0x17   : > { %1318 = vrot.lane.b32.xlu1 %v1317_v6, %s1409_s28  ;;  %1308 = vrot.lane.b32.xlu0 %v1317_v6, %s1410_s29  ;;  %v2188_v58 = vsel %vm1628_vm15, 4294967295, %v2187_v58  ;;  %v2193_v8 = vmov 0  ;;  %v1660_v9 = vsel %vm1602_vm2, 1, %v1408_v0  ;;  %vm1666_vm0 = vcmp.eq.s32.totalorder %v278_v43, 1 }
  0x18   : > { %vm1670_vm8 = vcmp.eq.s32.totalorder %v299_v44, 1  ;;  %v2197_v21 = vmov 0  ;;  %vm2199_vm2 = vmmov 1   ;;  %v1686_v24 = vsel %vm1639_vm3, 1, %v1408_v0 }
  0x19   : > { %v2198_v21 = vsel %vm1670_vm8, 4294967295, %v2197_v21  ;;  %vm1679_vm1 = vmpackc.low %vm2199_vm2, %vm1563_vm11  ;;  %v418_v25 = vrot.slane %v1595_v45, %v1512_v13  ;;  %v406_v27 = vrot.slane %v1595_v45, %v1520_v16  ;;  %vm2204_vm11 = vcmp.lt.s32.totalorder %v1514_v14, 1 }
  0x1a   : > { %vm1703_vm3 = vmpackc.low %vm2199_vm2, %vm1567_vm12  ;;  %vm1707_vm8 = vcmp.eq.s32.totalorder %v290_v53, 1  ;;  %v2210_v44 = vmov 0  ;;  %vm1761_vm12 = vcmp.eq.s32.totalorder %v307_v55, 1  ;;  %v397_v55 = vrot.slane %v1686_v24, %v1512_v13 }
  0x1b   : > { %1328 = vrot.lane.b32.xlu1 %v1317_v6, %s1411_s30  ;;  %1323 = vrot.lane.b32.xlu0 %v1312_v4, %s1411_s30 }
  0x1f   : > { %1338 = vrot.lane.b32.xlu1 %v1317_v6, %s1412_s7  ;;  %1333 = vrot.lane.b32.xlu0 %v1312_v4, %s1412_s7 }
  0x23   : > { %1348 = vrot.lane.b32.xlu1 %v1317_v6, %s1413_s8  ;;  %1343 = vrot.lane.b32.xlu0 %v1312_v4, %s1413_s8 }
  0x27   : > { %1358 = vrot.lane.b32.xlu1 %v1317_v6, %s1414_s9  ;;  %1353 = vrot.lane.b32.xlu0 %v1312_v4, %s1414_s9 }
  0x2b   : > { %1368 = vrot.lane.b32.xlu1 %v1317_v6, %s1415_s10  ;;  %1363 = vrot.lane.b32.xlu0 %v1312_v4, %s1415_s10 }
  0x2f   : > { %1378 = vrot.lane.b32.xlu1 %v1317_v6, %s1416_s11  ;;  %1373 = vrot.lane.b32.xlu0 %v1312_v4, %s1416_s11 }
  0x33   : > { %912 = vperm.xlu0 %1382, %v909_v7   ;;  %v436_v7 = vrot.slane %v1660_v9, %v1527_v19 }
  0x85   : > { %v1314_v39 = vpop.permute.xlu1 %1313  ;;  %v1581_v40 = vpop.permute.xlu0 %1303 }
  0x86   : > { %v1316_v46 = vunpack.i.h.bf16 %v1314_v39  ;;  %v1315_v47 = vunpack.i.l.bf16 %v1314_v39  ;;  %v1306_v48 = vunpack.i.h.bf16 %v1581_v40  ;;  %v1305_v49 = vunpack.i.l.bf16 %v1581_v40 }
  0x88   : > { %v518_v56 = vsel %vm2151_vm6, %v1305_v49, %v1306_v48  ;;  %v535_v57 = vsel %vm2152_vm5, %v1315_v47, %v1316_v46  ;;  %vm1649_vm6 = vcmp.eq.s32.totalorder %v282_v42, 1  ;;  %vm1653_vm5 = vcmp.eq.s32.totalorder %v303_v37, 1 }
  0x89   : > { %v1643_v62 = vpop.permute.xlu1 %1318  ;;  %v1309_v63 = vpop.permute.xlu0 %1308  ;;  %v1222_v4 = vpack.c.bf16 %v1475_v2, %v518_v56  ;;  %v537_v6 = vsel %vm1571_vm13, %v535_v57, 0.0  ;;  %v2194_v8 = vsel %vm1653_vm5, 4294967295, %v2193_v8  ;;  %v410_v2 = vrot.slane %v1595_v45, %v1509_v12  ;;  %vm2205_vm13 = vmmov %vm2204_vm11 }
  0x8a   : > { %v1321_v11 = vunpack.i.h.bf16 %v1643_v62  ;;  %v1320_v15 = vunpack.i.l.bf16 %v1643_v62  ;;  %v1311_v17 = vunpack.i.h.bf16 %v1309_v63  ;;  %v1310_v18 = vunpack.i.l.bf16 %v1309_v63 }
  0x8b   : > { %1223 = vmatprep.subr.msk.bf16.mxu0 %vm1609_vm4, %v1222_v4  ;;  %v545_v23 = vpack.c.bf16 %v537_v6, %v537_v6  ;;  %vm2202_vm4 = vcmp.lt.s32.totalorder %v1514_v14, 127  ;;  %v2221_v6 = vmov 0 }
  0x8c   : > { %v534_v29 = vsel %vm2202_vm4, %v1316_v46, %v1320_v15  ;;  %vm2203_vm10 = vmmov %vm2202_vm4  ;;  %v519_v37 = vsel %vm2204_vm11, %v1311_v17, %v1305_v49  ;;  %v516_v39 = vsel %vm2205_vm13, %v1310_v18, %v1311_v17  ;;  %vm1711_vm4 = vcmp.eq.s32.totalorder %v311_v38, 1 }
  0x8d   : > { %v536_v30 = vsel %vm2203_vm10, %v1321_v11, %v1315_v47  ;;  %v2211_v44 = vsel %vm1711_vm4, 4294967295, %v2210_v44  ;;  %v538_v46 = vsel %vm1547_vm7, %v534_v29, 0.0  ;;  %v1719_v49 = vpop.permute.xlu1 %1328  ;;  %v1721_v50 = vpop.permute.xlu0 %1323  ;;  %v1225_v51 = vpack.c.bf16 %v1473_v1, %v519_v37 }
  0x8e   : > { %v540_v47 = vsel %vm1555_vm9, %v536_v30, 0.0  ;;  %v1230_v53 = vpack.c.bf16 %v1481_v5, %v516_v39  ;;  %v1331_v38 = vunpack.i.h.bf16 %v1719_v49  ;;  %v1330_v56 = vunpack.i.l.bf16 %v1719_v49 }
  0x8f   : > { %vm1731_vm11 = vcmp.eq.s32.totalorder %v333_v36, 1  ;;  %vm1735_vm13 = vcmp.eq.s32.totalorder %v329_v60, 1  ;;  %v432_v1 = vrot.slane %v1660_v9, %v1509_v12  ;;  %v440_v5 = vrot.slane %v1660_v9, %v1512_v13  ;;  %1226 = vmatpush1.bf16.msk.msra.mxu0 %vm1679_vm1, %v1225_v51  ;;  %vm1768_vm1 = vmpackc.low %vm2199_vm2, %vm1583_vm14  ;;  %v928_v13 = vld [vmem:[%s2147_s5] sm:$0xff] }
  0x90   : > { %v1326_v62 = vunpack.i.h.bf16 %v1721_v50  ;;  %v1325_v63 = vunpack.i.l.bf16 %v1721_v50  ;;  %1231 = vmatprep.subr.msk.bf16.mxu1 %vm1703_vm3, %v1230_v53  ;;  %v546_v26 = vpack.c.bf16 %v538_v46, %v538_v46  ;;  %vm2216_vm10 = vcmp.lt.s32.totalorder %v1514_v14, 1  ;;  %931 = vperm.xlu1 %1383, %v928_v13  }
  0x91   : > { %v517_v36 = vsel %vm2216_vm10, %v1306_v48, %v1310_v18  ;;  %vm1753_vm9 = vcmp.eq.s32.totalorder %v325_v52, 1  ;;  %vm1757_vm7 = vcmp.eq.s32.totalorder %v286_v54, 1  ;;  %v2222_v6 = vsel %vm1761_vm12, 4294967295, %v2221_v6  ;;  %v1339_v22 = vpop.permute.xlu1 %1338  ;;  %v1334_v29 = vpop.permute.xlu0 %1333 }
  0x92   : > { %v548_v48 = vpack.c.bf16 %v540_v47, %v540_v47  ;;  %vm1772_vm3 = vcmp.eq.s32.totalorder %v321_v59, 1  ;;  %v2225_v52 = vmov 0  ;;  %v389_v54 = vrot.slane %v1686_v24, %v1509_v12 }
  0x93   : > { %v2226_v52 = vsel %vm1772_vm3, 4294967295, %v2225_v52  ;;  %v414_v17 = vrot.slane %v1595_v45, %v1527_v19  ;;  %vm2227_vm10 = vcmask 1043456   ;;  %v1233_v18 = vpack.c.bf16 %v1477_v3, %v517_v36 }
  0x94   : > { %1227 = vmatprep.subr.msk.bf16.mxu0 %vm2227_vm10, %v546_v26  ;;  %vm2228_vm2 = vmmov %vm2227_vm10  ;;  %vm2229_vm14 = vcmp.lt.s32.totalorder %v1514_v14, 127  ;;  %v385_v37 = vrot.slane %v1686_v24, %v1520_v16  ;;  %v1341_v39 = vunpack.i.h.bf16 %v1339_v22  ;;  %v1340_v42 = vunpack.i.l.bf16 %v1339_v22 }
  0x95   : > { %v557_v59 = vsel %vm2228_vm2, %v545_v23, 0  ;;  %v533_v30 = vsel %vm2229_vm14, %v1320_v15, %v1321_v11  ;;  %v1336_v46 = vunpack.i.h.bf16 %v1334_v29  ;;  %v1335_v47 = vunpack.i.l.bf16 %v1334_v29  ;;  %1234 = vmatpush1.bf16.msk.msra.mxu1 %vm1768_vm1, %v1233_v18  ;;  %v1220_v15 = vld [vmem:[%s2144_s2 + $0x4] sm:$0xf]  ;;  %v1349_v22 = vpop.permute.xlu1 %1348  ;;  %v1344_v29 = vpop.permute.xlu0 %1343 }
  0x96   : > { %vm2230_vm10 = vcmp.lt.s32.totalorder %v1514_v14, 17  ;;  %571 = vmatpush1.bf16.msra.mxu0 %v557_v59  ;;  %v539_v11 = vsel %vm1628_vm15, %v533_v30, 0.0  ;;  %v393_v50 = vrot.slane %v1686_v24, %v1527_v19  ;;  %vm2233_vm2 = vcmp.lt.s32.totalorder %v1514_v14, 16 }
  0x97   : > { %v456_v3 = vsel %vm2230_vm10, %v1330_v56, %v1331_v38  ;;  %vm2231_vm12 = vmmov %vm2230_vm10  ;;  %v473_v53 = vsel %vm2233_vm2, %v1340_v42, %v1341_v39  ;;  %v2241_v59 = vmov 0  ;;  %v547_v30 = vpack.c.bf16 %v539_v11, %v539_v11 }
  0x98   : > { %v458_v23 = vsel %vm2231_vm12, %v1325_v63, %v1326_v62  ;;  %vm2232_vm14 = vmmov %vm2230_vm10  ;;  %vm2236_vm10 = vcmask 1043456   ;;  %v1246_v40 = vpack.c.bf16 %v473_v53, %v456_v3  ;;  %vm2248_vm3 = vcmp.lt.s32.totalorder %v1514_v14, 17 }
  0x99   : > { %v459_v51 = vsel %vm2232_vm14, %v1331_v38, %v1325_v63  ;;  %vm2234_vm12 = vmmov %vm2233_vm2  ;;  %1235 = vmatprep.subr.msk.bf16.mxu1 %vm2236_vm10, %v548_v48  ;;  %vm2238_vm14 = vnez %v2198_v21  ;;  %vm1832_vm10 = vcmp.eq.s32.totalorder %v410_v2, 1  ;;  %v457_v2 = vsel %vm2248_vm3, %v1326_v62, %v1330_v56  ;;  %v1354_v53 = vpop.permute.xlu0 %1353 }
  0x9a   : > { %v475_v26 = vsel %vm2234_vm12, %v1335_v47, %v1336_v46  ;;  %vm2235_vm1 = vmmov %vm2233_vm2  ;;  %v2242_v59 = vsel %vm1832_vm10, 4294967295, %v2241_v59  ;;  %vm1837_vm2 = vcmp.eq.s32.totalorder %v397_v55, 1  ;;  %vm1844_vm12 = vcmp.eq.s32.totalorder %v418_v25, 1 }
  0x9b   : > { %v476_v36 = vsel %vm2235_vm1, %v1341_v39, %v1335_v47  ;;  %vm2237_vm15 = vmmov %vm2235_vm1  ;;  %v1238_v63 = vpack.c.bf16 %v475_v26, %v458_v23  ;;  %vm1825_vm1 = vcmp.eq.s32.totalorder %v389_v54, 1  ;;  %v1351_v39 = vunpack.i.h.bf16 %v1349_v22 }
  0x9c   : > { %v474_v38 = vsel %vm2237_vm15, %v1336_v46, %v1340_v42  ;;  %v1241_v18 = vpack.c.bf16 %v476_v36, %v459_v51  ;;  %v1350_v42 = vunpack.i.l.bf16 %v1349_v22  ;;  %v1346_v46 = vunpack.i.h.bf16 %v1344_v29  ;;  %v1359_v51 = vpop.permute.xlu1 %1358 }
  0x9d   : > { %vm2243_vm15 = vcmask 195584   ;;  %v2244_v47 = vmov 0  ;;  %v2246_v54 = vmov 0  ;;  %v1345_v3 = vunpack.i.l.bf16 %v1344_v29 }
  0x9e   : > { %1228 = vmatmul.mubr.msk.bf16.vlgmr.msra.gmra.mrb[0].mxu0 %vm2243_vm15, %v1220_v15  ;;  %v2245_v47 = vsel %vm1837_vm2, 4294967295, %v2244_v47  ;;  %v2247_v54 = vsel %vm1844_vm12, 4294967295, %v2246_v54  ;;  %vm2249_vm15 = vmpackc.low %vm1653_vm5, %vm1649_vm6  ;;  %vm1865_vm12 = vcmp.eq.s32.totalorder %v406_v27, 1  ;;  %v428_v49 = vrot.slane %v1660_v9, %v1520_v16 }
  0x9f   : > { %1239 = vmatprep.subr.msk.bf16.mxu0 %vm2249_vm15, %v1238_v63  ;;  %697 = vmatprep.mubr.bf16.mxu0 %v1408_v0  ;;  %v1249_v56 = vpack.c.bf16 %v474_v38, %v457_v2  ;;  %vm2252_vm6 = vcmask 1043456   ;;  %vm2253_vm3 = vcmp.lt.s32.totalorder %v1514_v14, 15  ;;  %vm2255_vm2 = vmpackc.low %vm2238_vm14, %vm1666_vm0  ;;  %vm1883_vm5 = vcmp.eq.s32.totalorder %v414_v17, 1  ;;  %v1253_v63 = vld [vmem:[%s2144_s2 + $0x8] sm:$0xf] }
  0xa0   : > { %v563_v62 = vsel %vm2252_vm6, %v547_v30, 0  ;;  %v490_v55 = vsel %vm2253_vm3, %v1350_v42, %v1351_v39  ;;  %vm2254_vm15 = vmmov %vm2253_vm3  ;;  %1242 = vmatpush1.bf16.msk.msra.mxu0 %vm2255_vm2, %v1241_v18  ;;  %v493_v11 = vsel %vm2253_vm3, %v1351_v39, %v1345_v3  ;;  %vm2260_vm2 = vnez %v2222_v6 }
  0xa1   : > { %v491_v23 = vsel %vm2254_vm15, %v1346_v46, %v1350_v42  ;;  %612 = vmatpush1.bf16.msra.mxu1 %v563_v62  ;;  %v497_v19 = vsel %vm1731_vm11, %v490_v55, 0.0  ;;  %vm2258_vm6 = vmmov %vm2253_vm3  ;;  %v1361_v57 = vunpack.i.h.bf16 %v1359_v51  ;;  %v1360_v26 = vunpack.i.l.bf16 %v1359_v51 }
  0xa2   : > { %v492_v27 = vsel %vm2258_vm6, %v1345_v3, %v1346_v46  ;;  %v496_v20 = vsel %vm1735_vm13, %v491_v23, 0.0  ;;  %vm2259_vm11 = vmpackc.low %vm1711_vm4, %vm1707_vm8  ;;  %v1356_v61 = vunpack.i.h.bf16 %v1354_v53  ;;  %vm1910_vm13 = vcmp.eq.s32.totalorder %v432_v1, 1 }
  0xa3   : > { %v495_v17 = vsel %vm1753_vm9, %v492_v27, 0.0  ;;  %1247 = vmatprep.subr.msk.bf16.mxu1 %vm2259_vm11, %v1246_v40  ;;  %vm1248_vm15 = vmpackc.low %vm2260_vm2, %vm1757_vm7  ;;  %vm1917_vm9 = vcmp.eq.s32.totalorder %v440_v5, 1  ;;  %v1355_v4 = vunpack.i.l.bf16 %v1354_v53  ;;  %v505_v40 = vpack.c.bf16 %v497_v19, %v497_v19 }
  0xa4   : > { %v503_v36 = vpack.c.bf16 %v495_v17, %v495_v17  ;;  %vm2265_vm7 = vnez %v2226_v52  ;;  %vm2266_vm8 = vcmask 195584   ;;  %v504_v1 = vpack.c.bf16 %v496_v20, %v496_v20  ;;  %v1369_v52 = vpop.permute.xlu1 %1368 }
  0xa5   : > { %v494_v38 = vsel %vm2265_vm7, %v493_v11, 0.0  ;;  %1236 = vmatmul.mubr.msk.bf16.vlgmr.msra.gmra.mrb[0].mxu1 %vm2266_vm8, %v1220_v15  ;;  %vm1927_vm6 = vcmp.eq.s32.totalorder %v385_v37, 1  ;;  %vm1931_vm3 = vcmp.eq.s32.totalorder %v393_v50, 1  ;;  %vm2271_vm11 = vcmp.lt.s32.totalorder %v1514_v14, 113  ;;  %v1364_v15 = vpop.permute.xlu0 %1363 }
  0xa6   : > { %v502_v12 = vpack.c.bf16 %v494_v38, %v494_v38  ;;  %1250 = vmatpush1.bf16.msk.msra.mxu1 %vm1248_vm15, %v1249_v56  ;;  %v756_v9 = vsel %vm2271_vm11, %v1360_v26, %v1361_v57  ;;  %vm2272_vm7 = vmmov %vm2271_vm11  ;;  %vm2273_vm8 = vcmask 1043456   ;;  %vm1940_vm0 = vcmp.eq.s32.totalorder %v428_v49, 1  ;;  %738 = vmatprep.mubr.bf16.mxu1 %v1408_v0 }
  0xa7   : > { %v757_v5 = vsel %vm2272_vm7, %v1356_v61, %v1360_v26  ;;  %1243 = vmatprep.subr.msk.bf16.mxu0 %vm2273_vm8, %v503_v36  ;;  %v2274_v16 = vmov 0  ;;  %vm1944_vm4 = vcmp.eq.s32.totalorder %v436_v7, 1  ;;  %v2276_v24 = vmov 0  ;;  %vm2278_vm2 = vmmov %vm2273_vm8  ;;  %v506_v7 = vld [vmem:[%s2144_s2] sm:$0xf] }
  0xa8   : > { %v2275_v16 = vsel %vm1940_vm0, 4294967295, %v2274_v16  ;;  %v2277_v24 = vsel %vm1944_vm4, 4294967295, %v2276_v24  ;;  %1251 = vmatprep.subr.msk.bf16.mxu1 %vm2278_vm2, %v505_v40  ;;  %v1371_v37 = vunpack.i.h.bf16 %v1369_v52  ;;  %v1370_v50 = vunpack.i.l.bf16 %v1369_v52  ;;  %vm2279_vm15 = vmmov %vm2272_vm7  ;;  %v1379_v19 = vpop.permute.xlu1 %1378 }
  0xa9   : > { %v1366_v18 = vunpack.i.h.bf16 %v1364_v15  ;;  %v1365_v22 = vunpack.i.l.bf16 %v1364_v15  ;;  %v758_v29 = vsel %vm2279_vm15, %v1355_v4, %v1356_v61  ;;  %vm2280_vm11 = vmmov %vm2272_vm7  ;;  %vm2283_vm14 = vcmp.lt.s32.totalorder %v1514_v14, 112  ;;  %v1374_v27 = vpop.permute.xlu0 %1373 }
  0xaa   : > { %v759_v30 = vsel %vm2280_vm11, %v1361_v57, %v1355_v4  ;;  %vm2281_vm7 = vmmov %vm2278_vm2  ;;  %v773_v46 = vsel %vm2283_vm14, %v1370_v50, %v1371_v37  ;;  %v1381_v11 = vunpack.i.h.bf16 %v1379_v19  ;;  %v1380_v51 = vunpack.i.l.bf16 %v1379_v19 }
  0xab   : > { %v654_v39 = vsel %vm2281_vm7, %v502_v12, 0  ;;  %vm2282_vm8 = vmmov %vm2278_vm2  ;;  %v1266_v56 = vpack.c.bf16 %v773_v46, %v756_v9  ;;  %v1376_v53 = vunpack.i.h.bf16 %v1374_v27  ;;  %v1375_v20 = vunpack.i.l.bf16 %v1374_v27 }
  0xac   : > { %v660_v42 = vsel %vm2282_vm8, %v504_v1, 0  ;;  %vm2284_vm2 = vmmov %vm2283_vm14  ;;  %668 = vmatpush1.bf16.msra.mxu0 %v654_v39  ;;  %vm2288_vm14 = vnez %v2247_v54  ;;  %vm2289_vm11 = vcmask 195584  }
  0xad   : > { %v774_v2 = vsel %vm2284_vm2, %v1366_v18, %v1370_v50  ;;  %vm2285_vm4 = vmmov %vm2284_vm2  ;;  %709 = vmatpush1.bf16.msra.mxu1 %v660_v42 }
  0xae   : > { %v775_v3 = vsel %vm2285_vm4, %v1365_v22, %v1366_v18  ;;  %vm2286_vm0 = vmmov %vm2284_vm2  ;;  %v1255_v62 = vpack.c.bf16 %v774_v2, %v757_v5  ;;  %vm2287_vm4 = vnez %v2245_v47  ;;  %vm2291_vm2 = vcmp.lt.s32.totalorder %v1514_v14, 111 }
  0xaf   : > { %v776_v49 = vsel %vm2286_vm0, %v1371_v37, %v1365_v22  ;;  %vm1254_vm15 = vmpackc.low %vm1832_vm10, %vm1825_vm1  ;;  %v1258_v55 = vpack.c.bf16 %v775_v3, %v758_v29  ;;  %1244 = vmatmul.mubr.msk.bf16.vlgmr.msra.gmra.mrb[4].mxu0 %vm2289_vm11, %v506_v7  ;;  %v790_v48 = vsel %vm2291_vm2, %v1380_v51, %v1381_v11 }
  0xb0   : > { %v1263_v23 = vpack.c.bf16 %v776_v49, %v759_v30  ;;  %vm1257_vm1 = vmpackc.low %vm1865_vm12, %vm1927_vm6  ;;  %1256 = vmatprep.subr.msk.bf16.mxu0 %vm1254_vm15, %v1255_v62  ;;  %vm2296_vm15 = vnez %v2275_v16  ;;  %855 = vmatprep.mubr.bf16.mxu0 %v1408_v0 }
  0xb1   : > { %vm1265_vm7 = vmpackc.low %vm1883_vm5, %vm1931_vm3  ;;  %1259 = vmatpush1.bf16.msk.msra.mxu0 %vm1257_vm1, %v1258_v55 }
  0xb2   : > { %vm2290_vm8 = vmmov %vm2289_vm11  ;;  %v913_v62 = vpop.permute.xlu0 %912 }
  0xb3   : > { %1252 = vmatmul.mubr.msk.bf16.vlgmr.msra.gmra.mrb[4].mxu1 %vm2290_vm8, %v506_v7  ;;  %vm2292_vm0 = vmmov %vm2291_vm2 }
  0xb4   : > { %v791_v17 = vsel %vm2292_vm0, %v1376_v53, %v1380_v51  ;;  %vm2293_vm10 = vmmov %vm2292_vm0  ;;  %896 = vmatprep.mubr.bf16.mxu1 %v1408_v0 }
  0xb5   : > { %v792_v57 = vsel %vm2293_vm10, %v1375_v20, %v1376_v53  ;;  %vm2294_vm6 = vmmov %vm2292_vm0  ;;  %v795_v61 = vsel %vm1910_vm13, %v791_v17, 0.0  ;;  %vm2297_vm10 = vnez %v2277_v24  ;;  %vm2298_vm13 = vcmask 1043456  }
  0xb6   : > { %v793_v26 = vsel %vm2294_vm6, %v1381_v11, %v1375_v20  ;;  %vm2295_vm3 = vmpackc.low %vm2288_vm14, %vm2287_vm4  ;;  %v794_v36 = vsel %vm2296_vm15, %v792_v57, 0.0  ;;  %v796_v40 = vsel %vm2297_vm10, %v790_v48, 0.0  ;;  %v803_v38 = vpack.c.bf16 %v795_v61, %v795_v61 }
  0xb7   : > { %v797_v4 = vsel %vm1917_vm9, %v793_v26, 0.0  ;;  %1264 = vmatprep.subr.msk.bf16.mxu1 %vm2295_vm3, %v1263_v23  ;;  %v802_v12 = vpack.c.bf16 %v794_v36, %v794_v36  ;;  %v804_v1 = vpack.c.bf16 %v796_v40, %v796_v40  ;;  %vm2299_vm9 = vmmov %vm2298_vm13  ;;  %vm934_vm3 = vcmask 64512  }
  0xb8   : > { %1267 = vmatpush1.bf16.msk.msra.mxu1 %vm1265_vm7, %v1266_v56  ;;  %v805_v60 = vpack.c.bf16 %v797_v4, %v797_v4  ;;  %1260 = vmatprep.subr.msk.bf16.mxu0 %vm2298_vm13, %v803_v38  ;;  %vm2300_vm4 = vmmov %vm2299_vm9  ;;  %vm2308_vm15 = vcmp.lt.s32.totalorder %v1514_v14, 1  ;;  %vm2310_vm13 = vnez %v2176_v33 }
  0xb9   : > { %v812_v47 = vsel %vm2300_vm4, %v802_v12, 0  ;;  %vm2301_vm0 = vmmov %vm2300_vm4  ;;  %vm2312_vm4 = vnez %v2174_v32 }
  0xba   : > { %1268 = vmatprep.subr.msk.bf16.mxu1 %vm2299_vm9, %v805_v60  ;;  %v818_v43 = vsel %vm2301_vm0, %v804_v1, 0  ;;  %826 = vmatpush1.bf16.msra.mxu0 %v812_v47  ;;  %vm2302_vm1 = vmmov %vm2290_vm8 }
  0xbb   : > { %vm2303_vm11 = vmmov %vm2302_vm1 }
  0xbc   : > { %867 = vmatpush1.bf16.msra.mxu1 %v818_v43  ;;  %vm2304_vm7 = vmmov %vm2301_vm0 }
  0xbd   : > { %1261 = vmatmul.mubr.msk.bf16.vlgmr.msra.gmra.mrb[8].mxu0 %vm2302_vm1, %v1253_v63  ;;  %vm2305_vm8 = vmmov %vm2301_vm0  ;;  %vm2314_vm1 = vcmp.lt.s32.totalorder %v1514_v14, 127 }
  0xbe   : > { %982 = vmatprep.mubr.bf16.mxu0 %v1408_v0  ;;  %vm2306_vm2 = vmmov %vm2301_vm0 }
  0xbf   : > { %1269 = vmatmul.mubr.msk.bf16.vlgmr.msra.gmra.mrb[8].mxu1 %vm2303_vm11, %v1253_v63  ;;  %vm2307_vm6 = vmmov %vm2301_vm0  ;;  %vm2315_vm11 = vnez %v2178_v34 }
  0xc0   : > { %1023 = vmatprep.mubr.bf16.mxu1 %v1408_v0  ;;  %vm2309_vm10 = vmmov %vm2308_vm15 }
  0xc1   : > { %vm2311_vm9 = vmmov %vm2309_vm10 }
  0xc2   : > { %vm2313_vm0 = vmmov %vm2311_vm9 }
 0x171   : > { %v602_v9 = vpop.f32.mrb[0].mxu0 }
 0x172   : > { %v604_v5 = vpop.f32.mrb[1].mxu0 }
 0x173   : > { %v606_v52 = vpop.f32.mrb[2].mxu0 }
 0x174   : > { %v607_v15 = vpop.f32.mrb[3].mxu0  ;;  %v932_v52 = vpop.permute.xlu1 %931 }
 0x178   : > { %v643_v16 = vpop.f32.mrb[0].mxu1 }
 0x179   : > { %v645_v24 = vpop.f32.mrb[1].mxu1 }
 0x17a   : > { %v647_v37 = vpop.f32.mrb[2].mxu1 }
 0x17b   : > { %v648_v50 = vpop.f32.mrb[3].mxu1 }
 0x182   : > { %v699_v18 = vpop.f32.mrb[4].mxu0 }
 0x183   : > { %v700_v22 = vadd.f32 %v699_v18, %v602_v9  ;;  %v701_v30 = vpop.f32.mrb[5].mxu0 }
 0x184   : > { %v702_v42 = vadd.f32 %v701_v30, %v604_v5  ;;  %v703_v46 = vpop.f32.mrb[6].mxu0  ;;  %v923_v5 = vld [vmem:[%s2146_s4] sm:$0xf] }
 0x185   : > { %v704_v3 = vpop.f32.mrb[7].mxu0 }
 0x186   : > { %v740_v29 = vpop.f32.mrb[4].mxu1 }
 0x187   : > { %v741_v39 = vadd.f32 %v740_v29, %v643_v16  ;;  %v742_v0 = vpop.f32.mrb[5].mxu1 }
 0x188   : > { %v743_v2 = vadd.f32 %v742_v0, %v645_v24  ;;  %v744_v49 = vpop.f32.mrb[6].mxu1 }
 0x189   : > { %v745_v7 = vpop.f32.mrb[7].mxu1 }
 0x190   : > { %v857_v56 = vpop.f32.mrb[8].mxu0 }
 0x191   : > { %v905_v55 = vadd.f32 %v857_v56, %v700_v22  ;;  %v859_v19 = vpop.f32.mrb[9].mxu0 }
 0x192   : > { %v898_v23 = vpop.f32.mrb[8].mxu1  ;;  %v906_v11 = vadd.f32 %v859_v19, %v702_v42  ;;  %v861_v53 = vpop.f32.mrb[10].mxu0 }
 0x193   : > { %v907_v27 = vadd.f32 %v898_v23, %v741_v39  ;;  %v900_v51 = vpop.f32.mrb[9].mxu1  ;;  %v915_v48 = vadd.f32 %v913_v62, %v905_v55  ;;  %v862_v17 = vpop.f32.mrb[11].mxu0 }
 0x194   : > { %v908_v20 = vadd.f32 %v900_v51, %v743_v2  ;;  %v902_v57 = vpop.f32.mrb[10].mxu1  ;;  %v916_v26 = vadd.f32 %v913_v62, %v906_v11 }
 0x195   : > { %v917_v61 = vadd.f32 %v913_v62, %v907_v27  ;;  %v903_v4 = vpop.f32.mrb[11].mxu1  ;;  %v919_v40 = vmax.f32 %v915_v48, 0.0 }
 0x196   : > { %v918_v36 = vadd.f32 %v913_v62, %v908_v20  ;;  %v920_v38 = vmax.f32 %v916_v26, 0.0 }
 0x197   : > { %v921_v60 = vmax.f32 %v917_v61, 0.0  ;;  %v924_v1 = vpack.c.bf16 %v919_v40, %v919_v40 }
 0x198   : > { %v922_v12 = vmax.f32 %v918_v36, 0.0  ;;  %v925_v47 = vpack.c.bf16 %v920_v38, %v920_v38 }
 0x199   : > { %v926_v43 = vpack.c.bf16 %v921_v60, %v921_v60  ;;  %v939_v13 = vsel %vm2304_vm7, %v924_v1, 0  ;;  %vm2316_vm7 = vnez %v2180_v35 }
 0x19a   : > { %v927_v63 = vpack.c.bf16 %v922_v12, %v922_v12  ;;  %1270 = vmatprep.subr.msk.bf16.mxu0 %vm2305_vm8, %v925_v47  ;;  %vm2317_vm8 = vnez %v2182_v41 }
 0x19b   : > { %v945_v9 = vsel %vm2306_vm2, %v926_v43, 0  ;;  %951 = vmatpush1.bf16.msra.mxu0 %v939_v13  ;;  %vm2318_vm2 = vmmov %vm2314_vm1 }
 0x19c   : > { %1272 = vmatprep.subr.msk.bf16.mxu1 %vm2307_vm6, %v927_v63  ;;  %vm2319_vm6 = vnez %v2170_v28 }
 0x19d   : > { %992 = vmatpush1.bf16.msra.mxu1 %v945_v9 }
 0x19e   : > { %1271 = vmatmul.mubr.msk.bf16.vlgmr.msra.gmra.mrb[12].mxu0 %vm934_vm3, %v923_v5 }
 0x1a0   : > { %1273 = vmatmul.mubr.msk.bf16.vlgmr.msra.gmra.mrb[12].mxu1 %vm934_vm3, %v923_v5  ;;  %vm2320_vm3 = vmmov %vm2314_vm1 }
 0x271   : > { %v984_v15 = vpop.f32.mrb[12].mxu0 }
 0x272   : > { %v2029_v16 = vadd.f32 %v984_v15, %v932_v52  ;;  %v986_v24 = vpop.f32.mrb[13].mxu0 }
 0x273   : > { %v1025_v37 = vpop.f32.mrb[12].mxu1  ;;  %v2031_v50 = vadd.f32 %v986_v24, %v932_v52  ;;  %v988_v18 = vpop.f32.mrb[14].mxu0 }
 0x274   : > { %v2033_v22 = vadd.f32 %v1025_v37, %v932_v52  ;;  %v1027_v29 = vpop.f32.mrb[13].mxu1  ;;  %v1274_v30 = vmul.f32 -1.442695, %v2029_v16  ;;  %v989_v39 = vpop.f32.mrb[15].mxu0 }
 0x275   : > { %v2036_v42 = vadd.f32 %v1027_v29, %v932_v52  ;;  %v1029_v0 = vpop.f32.mrb[14].mxu1  ;;  %v1275_v46 = vmul.f32 -1.442695, %v2031_v50 }
 0x276   : > { %v1276_v2 = vmul.f32 -1.442695, %v2033_v22  ;;  %v1030_v3 = vpop.f32.mrb[15].mxu1  ;;  %1384 = vpow2.f32 %v1274_v30 }
 0x277   : > { %v1277_v49 = vmul.f32 -1.442695, %v2036_v42  ;;  %1386 = vpow2.f32 %v1275_v46 }
 0x278   : > { %1388 = vpow2.f32 %v1276_v2 }
 0x279   : > { %1390 = vpow2.f32 %v1277_v49 }
 0x280   : > { %v1385_v7 = vpop.eup %1384 }
 0x281   : > { %v1387_v56 = vpop.eup %1386  ;;  %v1044_v62 = vadd.f32 1.0, %v1385_v7 }
 0x282   : > { %v1389_v55 = vpop.eup %1388  ;;  %v1045_v23 = vadd.f32 1.0, %v1387_v56 }
 0x283   : > { %v1391_v19 = vpop.eup %1390  ;;  %1392 = vrcp.f32 %v1044_v62  ;;  %v1046_v27 = vadd.f32 1.0, %v1389_v55 }
 0x284   : > { %1394 = vrcp.f32 %v1045_v23  ;;  %v1047_v11 = vadd.f32 1.0, %v1391_v19 }
 0x285   : > { %1396 = vrcp.f32 %v1046_v27 }
 0x286   : > { %1398 = vrcp.f32 %v1047_v11 }
 0x28d   : > { %v1393_v51 = vpop.eup %1392 }
 0x28e   : > { %v1395_v53 = vpop.eup %1394  ;;  %1056 = vrot.lane.b32.xlu1 %v1393_v51, %s1410_s29 }
 0x28f   : > { %1058 = vrot.lane.b32.xlu0 %v1395_v53, %s1410_s29  ;;  %v1397_v20 = vpop.eup %1396 }
 0x290   : > { %v1399_v48 = vpop.eup %1398 }
 0x292   : > { %1060 = vrot.lane.b32.xlu1 %v1397_v20, %s1410_s29 }
 0x293   : > { %1062 = vrot.lane.b32.xlu0 %v1399_v48, %s1410_s29 }
 0x296   : > { %1076 = vrot.lane.b32.xlu1 %v1393_v51, %s1409_s28 }
 0x297   : > { %1078 = vrot.lane.b32.xlu0 %v1395_v53, %s1409_s28 }
 0x29a   : > { %1080 = vrot.lane.b32.xlu1 %v1397_v20, %s1409_s28 }
 0x29b   : > { %1082 = vrot.lane.b32.xlu0 %v1399_v48, %s1409_s28 }
 0x300   : > { %v1057_v17 = vpop.permute.xlu1 %1056 }
 0x301   : > { %v1059_v57 = vpop.permute.xlu0 %1058 }
 0x302   : > { %v1066_v36 = vsel %vm2309_vm10, %v1057_v17, %v1059_v57  ;;  %vm2322_vm10 = vnez %v2172_v31 }
 0x303   : > { %v1069_v1 = vsel %vm2312_vm4, %v1066_v36, -inf }
 0x304   : > { %v1061_v26 = vpop.permute.xlu1 %1060  ;;  %v1073_v52 = vmax.f32 %v1395_v53, %v1069_v1 }
 0x305   : > { %v1063_v61 = vpop.permute.xlu0 %1062  ;;  %v1065_v47 = vsel %vm2313_vm0, %v1059_v57, %v1061_v26  ;;  %vm2326_vm0 = vnez %v2198_v21 }
 0x306   : > { %v1067_v4 = vsel %vm2308_vm15, %v1063_v61, %v1057_v17  ;;  %v1064_v38 = vsel %vm2311_vm9, %v1061_v26, %v1063_v61  ;;  %v1070_v32 = vsel %vm2317_vm8, %v1065_v47, -inf  ;;  %vm2321_vm15 = vmmov %vm2314_vm1  ;;  %vm2324_vm9 = vcmp.lt.s32.totalorder %v1514_v14, 16 }
 0x307   : > { %v1068_v40 = vsel %vm2310_vm13, %v1067_v4, -inf  ;;  %v1071_v13 = vsel %vm2315_vm11, %v1064_v38, -inf  ;;  %vm2323_vm13 = vnez %v2188_v58  ;;  %v1074_v0 = vmax.f32 %v1397_v20, %v1070_v32  ;;  %vm2325_vm4 = vmmov %vm2324_vm9 }
 0x308   : > { %v1077_v60 = vpop.permute.xlu1 %1076  ;;  %v1072_v43 = vmax.f32 %v1393_v51, %v1068_v40  ;;  %v1075_v37 = vmax.f32 %v1399_v48, %v1071_v13  ;;  %vm2328_vm11 = vnez %v2194_v8  ;;  %vm2330_vm8 = vnez %v2222_v6 }
 0x309   : > { %v1079_v12 = vpop.permute.xlu0 %1078 }
 0x30a   : > { %v1086_v63 = vsel %vm2314_vm1, %v1077_v60, %v1079_v12  ;;  %vm2327_vm1 = vmmov %vm2325_vm4 }
 0x30b   : > { %v1088_v33 = vsel %vm2316_vm7, %v1086_v63, -inf  ;;  %vm2329_vm7 = vmmov %vm2327_vm1 }
 0x30c   : > { %v1092_v9 = vmax.f32 %v1072_v43, %v1088_v33  ;;  %v1081_v5 = vpop.permute.xlu1 %1080 }
 0x30d   : > { %v1085_v15 = vsel %vm2318_vm2, %v1079_v12, %v1081_v5  ;;  %v1083_v24 = vpop.permute.xlu0 %1082  ;;  %vm1138_vm2 = vcmp.lt.s32.totalorder %v1501_v10, 4 }
 0x30e   : > { %v1089_v18 = vsel %vm2319_vm6, %v1085_v15, -inf  ;;  %v1084_v34 = vsel %vm2320_vm3, %v1081_v5, %v1083_v24  ;;  %v1087_v35 = vsel %vm2321_vm15, %v1083_v24, %v1077_v60  ;;  %1096 = vrot.lane.b32.xlu1 %v1092_v9, %s1412_s7  ;;  %vm2331_vm6 = vcmp.lt.s32.totalorder %v1514_v14, 112 }
 0x30f   : > { %v1093_v29 = vmax.f32 %v1073_v52, %v1089_v18  ;;  %v1091_v41 = vsel %vm2322_vm10, %v1087_v35, -inf  ;;  %v1090_v30 = vsel %vm2323_vm13, %v1084_v34, -inf  ;;  %vm2332_vm3 = vnez %v2211_v44  ;;  %vm2333_vm15 = vmmov %vm2331_vm6 }
 0x310   : > { %v1095_v39 = vmax.f32 %v1075_v37, %v1091_v41  ;;  %v1094_v28 = vmax.f32 %v1074_v0, %v1090_v30  ;;  %vm2334_vm10 = vnez %v2242_v59  ;;  %vm2336_vm13 = vmmov %vm2331_vm6 }
 0x311   : > { %1098 = vrot.lane.b32.xlu0 %v1093_v29, %s1412_s7 }
 0x312   : > { %1102 = vrot.lane.b32.xlu1 %v1095_v39, %s1412_s7 }
 0x315   : > { %1100 = vrot.lane.b32.xlu0 %v1094_v28, %s1412_s7  ;;  %s258_s7 = scalar_lea.vmem %s2148_s6, %s1282_s24 }
 0x316   : > { %1116 = vrot.lane.b32.xlu1 %v1092_v9, %s1415_s10 }
 0x319   : > { %1118 = vrot.lane.b32.xlu0 %v1093_v29, %s1415_s10 }
 0x31a   : > { %1120 = vrot.lane.b32.xlu1 %v1094_v28, %s1415_s10 }
 0x31d   : > { %1122 = vrot.lane.b32.xlu0 %v1095_v39, %s1415_s10 }
 0x380   : > { %v1097_v31 = vpop.permute.xlu1 %1096 }
 0x383   : > { %v1099_v58 = vpop.permute.xlu0 %1098 }
 0x384   : > { %v1103_v46 = vpop.permute.xlu1 %1102  ;;  %v1106_v3 = vsel %vm2325_vm4, %v1097_v31, %v1099_v58 }
 0x385   : > { %v1107_v2 = vsel %vm2324_vm9, %v1103_v46, %v1097_v31  ;;  %v1109_v55 = vsel %vm2328_vm11, %v1106_v3, -inf }
 0x386   : > { %v1108_v56 = vsel %vm2326_vm0, %v1107_v2, -inf  ;;  %v1113_v53 = vmax.f32 %v1093_v29, %v1109_v55 }
 0x387   : > { %v1101_v49 = vpop.permute.xlu0 %1100  ;;  %v1112_v27 = vmax.f32 %v1092_v9, %v1108_v56 }
 0x388   : > { %v1117_v7 = vpop.permute.xlu1 %1116  ;;  %v1105_v62 = vsel %vm2327_vm1, %v1099_v58, %v1101_v49  ;;  %v1104_v23 = vsel %vm2329_vm7, %v1101_v49, %v1103_v46 }
 0x389   : > { %v1110_v11 = vsel %vm2330_vm8, %v1105_v62, -inf  ;;  %v1111_v20 = vsel %vm2332_vm3, %v1104_v23, -inf }
 0x38a   : > { %v1114_v57 = vmax.f32 %v1094_v28, %v1110_v11  ;;  %v1115_v44 = vmax.f32 %v1095_v39, %v1111_v20 }
 0x38b   : > { %v1119_v19 = vpop.permute.xlu0 %1118 }
 0x38c   : > { %v1126_v21 = vsel %vm2331_vm6, %v1117_v7, %v1119_v19  ;;  %v1121_v51 = vpop.permute.xlu1 %1120 }
 0x38d   : > { %v1128_v8 = vsel %vm1865_vm12, %v1126_v21, -inf  ;;  %v1125_v48 = vsel %vm2333_vm15, %v1119_v19, %v1121_v51  ;;  %vm2335_vm12 = vmmov %vm2331_vm6 }
 0x38e   : > { %v1132_v6 = vmax.f32 %v1112_v27, %v1128_v8  ;;  %v1129_v17 = vsel %vm2334_vm10, %v1125_v48, -inf }
 0x38f   : > { %v1133_v26 = vmax.f32 %v1113_v53, %v1129_v17  ;;  %v1123_v61 = vpop.permute.xlu0 %1122 }
 0x390   : > { %v1139_v25 = vsel %vm1138_vm2, %v1132_v6, %v2029_v16  ;;  %v1124_v4 = vsel %vm2335_vm12, %v1121_v51, %v1123_v61  ;;  %v1127_v36 = vsel %vm2336_vm13, %v1123_v61, %v1117_v7 }
 0x391   : > { %1143 = vst [vmem:[%s258_s7] sm:$0xff] %v1139_v25  ;;  %v1140_v59 = vsel %vm1138_vm2, %v1133_v26, %v2031_v50  ;;  %v1130_v40 = vsel %vm1883_vm5, %v1124_v4, -inf  ;;  %v1131_v38 = vsel %vm2288_vm14, %v1127_v36, -inf }
 0x392   : > { %1144 = vst [vmem:[%s258_s7 + $0x8] sm:$0xff] %v1140_v59  ;;  %v1134_v60 = vmax.f32 %v1114_v57, %v1130_v40  ;;  %v1135_v16 = vmax.f32 %v1115_v44, %v1131_v38 }
 0x394   : > { %v1141_v12 = vsel %vm1138_vm2, %v1134_v60, %v2033_v22  ;;  %v1142_v14 = vsel %vm1138_vm2, %v1135_v16, %v2036_v42 }
 0x395   : > { %1278 = vst [vmem:[%s258_s7 + $0x10] sm:$0xff] %v1141_v12  ;;  %1279 = vst [vmem:[%s258_s7 + $0x18] sm:$0xff] %v1142_v14 }
 0x396 PF: > { %s16_s21 = sadd.s32 1, %s1406_s21  }
 0x397   : > { %p13_p4 = scmp.ge.s32.totalorder %s16_s21, 4  }
 0x399   :  { %15 = sbr.rel (!%p13_p4) target bundleno = 1 (0x1), region = 79 }

</bundles_post_ra>
